<compile_context>
chip_gen: v7x
topology: tpu7x:2x2x1
jax: 0.10.0
libtpu: 0.0.40
codegen_flags: <defaults>
</compile_context>

<pallas_src>
import numpy as np
import jax
import jax.numpy as jnp
from jax import lax
from jax.experimental import pallas as pl
from jax.experimental.pallas import tpu as pltpu

NEG = -1e30     # finite stand-in for -inf (avoids inf-inf NaNs in log-space DP)
NB_CTC = 8      # CTC samples per grid step (one per sublane)
LP_CTC = 128    # extended-label states padded to one full lane vreg


# --------------- Kernel 1: fused log_softmax + CTC forward -----------------
def _ctc_kernel(logits_ref, onehot_ref, skip_ref, end_ref, tlen_v_ref,
                tlen_s_ref, o_ref, lp_ref):
    # logits_ref: (T, NB, C) raw logits (PyTorch CTC layout, one batch block)
    # onehot_ref: (NB, C, Lp) bf16 one-hot of extended labels
    # skip_ref:   (NB, Lp) f32, 0 where the 2-step skip is allowed, else NEG
    # end_ref:    (NB, Lp) f32, 0 at the two terminal states, else NEG
    # tlen_v_ref: (NB, 1) int32 valid input lengths (per-row freeze mask)
    # tlen_s_ref: (Npad,) int32 in SMEM (dynamic DP loop bound)
    # o_ref:      (NB, 1) f32 per-sample negative log likelihood
    # lp_ref:     (T, NB, Lp) f32 scratch: log p(t, n, ext[n, s])
    T = logits_ref.shape[0]
    NB = logits_ref.shape[1]
    Lp = onehot_ref.shape[2]

    # Fused log-softmax over the vocab dim + one-hot gather, one sample at a
    # time (keeps live intermediates at (T, C); one MXU matmul per sample).
    for i in range(NB):
        x = logits_ref[:, i, :]                                    # (T, C)
        m = jnp.max(x, axis=-1, keepdims=True)
        lp = x - (m + jnp.log(jnp.sum(jnp.exp(x - m), axis=-1, keepdims=True)))
        lp_ref[:, i, :] = jnp.dot(lp, onehot_ref[i].astype(jnp.float32),
                                  preferred_element_type=jnp.float32)

    lane = lax.broadcasted_iota(jnp.int32, (NB, Lp), 1)
    skip_add = skip_ref[...]
    end_add = end_ref[...]
    tlen_col = tlen_v_ref[...]                                     # (NB, 1)

    # alpha(0): states 0 (blank) and 1 (first label) only.
    alpha0 = lp_ref[0] + jnp.where(lane < 2, 0.0, NEG)             # (NB, Lp)

    # Dynamic loop bound: max valid length within this 8-sample block.
    base = pl.program_id(0) * NB
    t_max = tlen_s_ref[base]
    for i in range(1, NB):
        t_max = jnp.maximum(t_max, tlen_s_ref[base + i])
    t_max = jnp.minimum(t_max, T)

    def step(t, alpha):
        a1 = pltpu.roll(alpha, shift=1, axis=1)                    # alpha[s-1]
        a1 = jnp.where(lane >= 1, a1, NEG)
        a2 = pltpu.roll(alpha, shift=2, axis=1)                    # alpha[s-2]
        a2 = jnp.where(lane >= 2, a2, NEG) + skip_add
        m3 = jnp.maximum(jnp.maximum(alpha, a1), a2)
        lse = m3 + jnp.log(jnp.exp(alpha - m3) + jnp.exp(a1 - m3)
                           + jnp.exp(a2 - m3))
        new = jnp.maximum(lse + lp_ref[t], NEG)
        return jnp.where(t < tlen_col, new, alpha)                 # freeze rows

    alpha_T = lax.fori_loop(1, t_max, step, alpha0)

    final = alpha_T + end_add
    mf = jnp.max(final, axis=1, keepdims=True)
    o_ref[...] = -(mf + jnp.log(jnp.sum(jnp.exp(final - mf), axis=1,
                                        keepdims=True)))


def build_ctc_aux(targets, target_lengths, num_classes, Lp):
    """Vectorized (jnp) auxiliaries for the CTC DP. Handles target_length==0."""
    targets = jnp.asarray(targets, jnp.int32)
    tl = jnp.asarray(target_lengths, jnp.int32)
    N, S = targets.shape
    if 2 * S + 1 > Lp:
        raise ValueError(f"2*max_target_len+1 = {2*S+1} exceeds Lp = {Lp}")

    s_idx = jnp.arange(Lp, dtype=jnp.int32)                        # (Lp,)
    lab_pos = (s_idx - 1) // 2
    is_lab = (s_idx[None, :] % 2 == 1) & (lab_pos[None, :] < tl[:, None])
    if S > 0:
        lab_pos_c = jnp.clip(lab_pos, 0, S - 1)
        gathered = jnp.take_along_axis(
            targets, jnp.broadcast_to(lab_pos_c[None, :], (N, Lp)), axis=1)
    else:
        gathered = jnp.zeros((N, Lp), jnp.int32)
    ext = jnp.where(is_lab, gathered, 0).astype(jnp.int32)         # (N, Lp)

    L = 2 * tl + 1
    prev2 = jnp.roll(ext, 2, axis=1)
    skip_ok = (s_idx[None, :] >= 3) & (s_idx[None, :] % 2 == 1) & (ext != prev2)
    skip = jnp.where(skip_ok, 0.0, NEG).astype(jnp.float32)

    end_ok = (s_idx[None, :] == (L - 1)[:, None]) | (
        (s_idx[None, :] == (L - 2)[:, None]) & (tl[:, None] > 0))
    end = jnp.where(end_ok, 0.0, NEG).astype(jnp.float32)

    onehot = (ext[:, None, :] ==
              jnp.arange(num_classes, dtype=jnp.int32)[None, :, None]
              ).astype(jnp.bfloat16)                               # (N, C, Lp)
    return onehot, skip, end


def ctc_loss_pallas(logits_tnc, targets, target_lengths, t_lengths, Lp=LP_CTC):
    """Per-sample CTC NLL (reduction='none'). logits_tnc: (T, N, C)."""
    T, N, C = logits_tnc.shape
    NB = NB_CTC
    Npad = ((N + NB - 1) // NB) * NB
    pad = Npad - N

    logits = logits_tnc.astype(jnp.float32)
    targets = jnp.asarray(targets, jnp.int32)
    target_lengths = jnp.asarray(target_lengths, jnp.int32)
    t_lengths = jnp.asarray(t_lengths, jnp.int32)
    if pad:
        logits = jnp.pad(logits, ((0, 0), (0, pad), (0, 0)))
        targets = jnp.pad(targets, ((0, pad), (0, 0)))
        target_lengths = jnp.pad(target_lengths, (0, pad))          # empty tgt
        t_lengths = jnp.pad(t_lengths, (0, pad), constant_values=1)

    onehot, skip_add, end_add = build_ctc_aux(targets, target_lengths, C, Lp)
    tlen_v = t_lengths.reshape(Npad, 1)

    out = pl.pallas_call(
        _ctc_kernel,
        out_shape=jax.ShapeDtypeStruct((Npad, 1), jnp.float32),
        grid=(Npad // NB,),
        in_specs=[
            pl.BlockSpec((T, NB, C), lambda b: (0, b, 0)),
            pl.BlockSpec((NB, C, Lp), lambda b: (b, 0, 0)),
            pl.BlockSpec((NB, Lp), lambda b: (b, 0)),
            pl.BlockSpec((NB, Lp), lambda b: (b, 0)),
            pl.BlockSpec((NB, 1), lambda b: (b, 0)),
            pl.BlockSpec(memory_space=pltpu.MemorySpace.SMEM),
        ],
        out_specs=pl.BlockSpec((NB, 1), lambda b: (b, 0)),
        scratch_shapes=[pltpu.VMEM((T, NB, Lp), jnp.float32)],
        compiler_params=pltpu.CompilerParams(
            dimension_semantics=("parallel",)),
    )(logits, onehot, skip_add, end_add, tlen_v, t_lengths)
    return out[:N, 0]


# ------------------ Kernel 2: pose heatmap MSE reduction -------------------
def _mse_kernel(hm_ref, gray_ref, acc_ref):
    # hm_ref:   (1, 1, T, HW) heatmap block for (sample n, keypoint c)
    # gray_ref: (1, T, HW)    target block (shared across the Ck grid axis)
    # acc_ref:  (T, HW)       resident f32 elementwise accumulator
    @pl.when((pl.program_id(0) == 0) & (pl.program_id(1) == 0))
    def _init():
        acc_ref[...] = jnp.zeros_like(acc_ref)
    d = hm_ref[0, 0] - gray_ref[0]
    acc_ref[...] += d * d


def pose_mse_pallas(heatmap, input_frames, color_range):
    """MSE between heatmaps and the grayscale stand-in target (no transposes)."""
    N, Ck, T, H, W = heatmap.shape
    HW = H * W
    hm = heatmap.reshape(N, Ck, T, HW).astype(jnp.float32)
    # TODO(synk): HeatMapLoss internally runs a pretrained pose estimator
    # (from cfg/ckpt) on the input frames to produce target heatmaps; that
    # model is not reproducible here, so a deterministic stand-in target
    # (color_range-normalized grayscale, shared over keypoint channels) is
    # used. The MSE reduction hot path runs in the Pallas kernel.
    gray = (jnp.mean(input_frames.astype(jnp.float32), axis=1)
            / color_range).reshape(N, T, HW)

    acc = pl.pallas_call(
        _mse_kernel,
        out_shape=jax.ShapeDtypeStruct((T, HW), jnp.float32),
        grid=(N, Ck),   # Ck innermost -> gray block DMA'd once per sample
        in_specs=[
            pl.BlockSpec((1, 1, T, HW), lambda n, c: (n, c, 0, 0)),
            pl.BlockSpec((1, T, HW), lambda n, c: (n, 0, 0)),
        ],
        out_specs=pl.BlockSpec((T, HW), lambda n, c: (0, 0)),
        compiler_params=pltpu.CompilerParams(
            dimension_semantics=("arbitrary", "arbitrary")),
    )(hm, gray)
    return jnp.sum(acc) / (N * Ck * T * HW)


# ----------------------------- module wrapper -------------------------------
class MultiLossPallas:
    """Pallas port of MultiLoss.forward: w0 * CTC(log_softmax(out)) + w1 * pose."""

    def __init__(self, weights, color_range=255.0):
        self.weights = weights
        self.color_range = color_range

    def __call__(self, out_logits, heatmap, t_length, input_frames,
                 target, target_length):
        # out_logits: (T, N, C); heatmap: (N, Ck, T, H, W);
        # input_frames: (N, 3, T, H, W); target: (N, S) int; lengths: (N,) int
        loss = jnp.float32(0.0)

        if self.weights[0] > 0.0:
            nll = ctc_loss_pallas(out_logits, target, target_length, t_length)
            loss = loss + jnp.mean(nll) * self.weights[0]

        if self.weights[1] > 0.0:
            loss = loss + pose_mse_pallas(heatmap, input_frames,
                                          self.color_range) * self.weights[1]
        return loss


# --------------------------- pure reference ---------------------------------
def ctc_reference(logits, targets, input_lengths, target_lengths):
    logp = np.asarray(jax.nn.log_softmax(logits.astype(jnp.float32), axis=-1),
                      dtype=np.float64)
    T, N, C = logp.shape
    losses = []
    for n in range(N):
        Sn = int(target_lengths[n]); Tn = int(input_lengths[n])
        ext = [0]
        for i in range(Sn):
            ext += [int(targets[n, i]), 0]
        L = len(ext)
        alpha = np.full(L, NEG, dtype=np.float64)
        alpha[0] = logp[0, n, 0]
        alpha[1] = logp[0, n, ext[1]]
        for t in range(1, Tn):
            new = np.empty(L, dtype=np.float64)
            for s in range(L):
                vals = [alpha[s]]
                if s >= 1:
                    vals.append(alpha[s - 1])
                if s >= 2 and ext[s] != 0 and ext[s] != ext[s - 2]:
                    vals.append(alpha[s - 2])
                m = max(vals)
                new[s] = m + np.log(sum(np.exp(v - m) for v in vals)) + logp[t, n, ext[s]]
            alpha = new
        vals = [alpha[L - 1], alpha[L - 2]]
        m = max(vals)
        losses.append(-(m + np.log(sum(np.exp(v - m) for v in vals))))
    return np.array(losses)


if __name__ == "__main__":
    key = jax.random.PRNGKey(0)
    k1, k2, k3, k4 = jax.random.split(key, 4)

    T, N, C = 8, 2, 32          # decoder time steps, batch, vocab (blank = 0)
    Ck, H, W = 4, 16, 16        # keypoint heatmap channels, spatial
    S = 5                       # max target length

    weights = (1.0, 0.5)
    color_range = 255.0

    out_logits = jax.random.normal(k1, (T, N, C), dtype=jnp.float32)
    heatmap = jax.random.normal(k2, (N, Ck, T, H, W), dtype=jnp.float32)
    input_frames = jax.random.uniform(k3, (N, 3, T, H, W), dtype=jnp.float32,
                                      minval=0.0, maxval=255.0)
    target = jax.random.randint(k4, (N, S), 1, C)       # labels in [1, C-1]
    target_length = jnp.array([5, 4], dtype=jnp.int32)
    t_length = jnp.array([8, 7], dtype=jnp.int32)       # backbone output lengths

    loss_fn = MultiLossPallas(weights, color_range)
    total = loss_fn(out_logits, heatmap, t_length, input_frames,
                    target, target_length)
    total = jax.block_until_ready(total)

    # ---------------- reference check (host-side numpy) ----------------
    ctc_ref = ctc_reference(out_logits, np.asarray(target),
                            np.asarray(t_length), np.asarray(target_length))
    hm_np = np.asarray(heatmap, dtype=np.float64)
    gray_np = np.asarray(input_frames, dtype=np.float64).mean(
        axis=1, keepdims=True) / color_range                 # (N,1,T,H,W)
    mse_ref = np.mean((hm_np - gray_np) ** 2)                # bcast over Ck
    total_ref = ctc_ref.mean() * weights[0] + mse_ref * weights[1]

    assert np.isfinite(float(total)), "loss is not finite"
    np.testing.assert_allclose(float(total), float(total_ref),
                               rtol=1e-3, atol=1e-3)
    print("KERNEL_OK")
</pallas_src>

<mosaic_0001>
module attributes {stable_mosaic.version = 11 : i64} {
  func.func @_ctc_kernel(%arg0: i32, %arg1: memref<8x8x32xf32, #tpu.memory_space<vmem>>, %arg2: memref<8x32x128xbf16, #tpu.memory_space<vmem>>, %arg3: memref<8x128xf32, #tpu.memory_space<vmem>>, %arg4: memref<8x128xf32, #tpu.memory_space<vmem>>, %arg5: memref<8x1xi32, #tpu.memory_space<vmem>>, %arg6: memref<8xi32, #tpu.memory_space<smem>>, %arg7: memref<8x1xf32, #tpu.memory_space<vmem>>, %arg8: memref<8x8x128xf32, #tpu.memory_space<vmem>>) attributes {dimension_semantics = [#tpu.dimension_semantics<parallel>], iteration_bounds = array<i64: 1>, scalar_prefetch = 0 : i64, scratch_operands = 1 : i64, tpu.core_type = #tpu.core_type<tc>, window_params = [{transform_indices = @transform_0, window_bounds = array<i64: 8, 8, 32>}, {transform_indices = @transform_1, window_bounds = array<i64: 8, 32, 128>}, {transform_indices = @transform_2, window_bounds = array<i64: 8, 128>}, {transform_indices = @transform_3, window_bounds = array<i64: 8, 128>}, {transform_indices = @transform_4, window_bounds = array<i64: 8, 1>}, {transform_indices = @transform_5, window_bounds = array<i64: 8>}, {transform_indices = @transform_6, window_bounds = array<i64: 8, 1>}]} {
    %c0 = arith.constant 0 : index
    %c0_0 = arith.constant 0 : index
    %c0_1 = arith.constant 0 : index
    %0 = vector.load %arg1[%c0, %c0_0, %c0_1] : memref<8x8x32xf32, #tpu.memory_space<vmem>>, vector<8x1x32xf32>
    %1 = vector.shape_cast %0 : vector<8x1x32xf32> to vector<8x32xf32>
    %cst = arith.constant dense<0xFF800000> : vector<8xf32>
    %2 = vector.multi_reduction <maximumf>, %1, %cst [1] : vector<8x32xf32> to vector<8xf32>
    %3 = vector.shape_cast %2 : vector<8xf32> to vector<8x1xf32>
    %4 = vector.broadcast %3 : vector<8x1xf32> to vector<8x32xf32>
    %5 = arith.subf %1, %4 : vector<8x32xf32>
    %6 = math.exp %5 : vector<8x32xf32>
    %cst_2 = arith.constant dense<0.000000e+00> : vector<8xf32>
    %7 = vector.multi_reduction <add>, %6, %cst_2 [1] : vector<8x32xf32> to vector<8xf32>
    %8 = vector.shape_cast %7 : vector<8xf32> to vector<8x1xf32>
    %9 = math.log %8 : vector<8x1xf32>
    %10 = arith.addf %3, %9 : vector<8x1xf32>
    %11 = vector.broadcast %10 : vector<8x1xf32> to vector<8x32xf32>
    %12 = arith.subf %1, %11 : vector<8x32xf32>
    %c0_3 = arith.constant 0 : index
    %c0_4 = arith.constant 0 : index
    %c0_5 = arith.constant 0 : index
    %13 = vector.load %arg2[%c0_3, %c0_4, %c0_5] : memref<8x32x128xbf16, #tpu.memory_space<vmem>>, vector<1x32x128xbf16>
    %14 = vector.shape_cast %13 : vector<1x32x128xbf16> to vector<32x128xbf16>
    %15 = arith.extf %14 : vector<32x128xbf16> to vector<32x128xf32>
    %cst_6 = arith.constant dense<0.000000e+00> : vector<8x128xf32>
    %16 = tpu.matmul %12, %15, %cst_6 {dimension_numbers = #tpu.dot_dimension_numbers<[1], [0], [0], [1], [0, 0, 1, 1], [], []>} : vector<8x32xf32>, vector<32x128xf32>, vector<8x128xf32> -> vector<8x128xf32>
    %c0_7 = arith.constant 0 : index
    %c0_8 = arith.constant 0 : index
    %c0_9 = arith.constant 0 : index
    %17 = vector.load %arg8[%c0_7, %c0_8, %c0_9] : memref<8x8x128xf32, #tpu.memory_space<vmem>>, vector<8x1x128xf32>
    %18 = vector.shape_cast %17 : vector<8x1x128xf32> to vector<8x128xf32>
    %19 = vector.shape_cast %16 : vector<8x128xf32> to vector<8x1x128xf32>
    tpu.vector_store %arg8[%c0_7, %c0_8, %c0_9], %19 {strides = array<i32>} : memref<8x8x128xf32, #tpu.memory_space<vmem>>, vector<8x1x128xf32>,
    %c0_10 = arith.constant 0 : index
    %c1 = arith.constant 1 : index
    %c0_11 = arith.constant 0 : index
    %20 = vector.load %arg1[%c0_10, %c1, %c0_11] : memref<8x8x32xf32, #tpu.memory_space<vmem>>, vector<8x1x32xf32>
    %21 = vector.shape_cast %20 : vector<8x1x32xf32> to vector<8x32xf32>
    %cst_12 = arith.constant dense<0xFF800000> : vector<8xf32>
    %22 = vector.multi_reduction <maximumf>, %21, %cst_12 [1] : vector<8x32xf32> to vector<8xf32>
    %23 = vector.shape_cast %22 : vector<8xf32> to vector<8x1xf32>
    %24 = vector.broadcast %23 : vector<8x1xf32> to vector<8x32xf32>
    %25 = arith.subf %21, %24 : vector<8x32xf32>
    %26 = math.exp %25 : vector<8x32xf32>
    %cst_13 = arith.constant dense<0.000000e+00> : vector<8xf32>
    %27 = vector.multi_reduction <add>, %26, %cst_13 [1] : vector<8x32xf32> to vector<8xf32>
    %28 = vector.shape_cast %27 : vector<8xf32> to vector<8x1xf32>
    %29 = math.log %28 : vector<8x1xf32>
    %30 = arith.addf %23, %29 : vector<8x1xf32>
    %31 = vector.broadcast %30 : vector<8x1xf32> to vector<8x32xf32>
    %32 = arith.subf %21, %31 : vector<8x32xf32>
    %c1_14 = arith.constant 1 : index
    %c0_15 = arith.constant 0 : index
    %c0_16 = arith.constant 0 : index
    %33 = vector.load %arg2[%c1_14, %c0_15, %c0_16] : memref<8x32x128xbf16, #tpu.memory_space<vmem>>, vector<1x32x128xbf16>
    %34 = vector.shape_cast %33 : vector<1x32x128xbf16> to vector<32x128xbf16>
    %35 = arith.extf %34 : vector<32x128xbf16> to vector<32x128xf32>
    %cst_17 = arith.constant dense<0.000000e+00> : vector<8x128xf32>
    %36 = tpu.matmul %32, %35, %cst_17 {dimension_numbers = #tpu.dot_dimension_numbers<[1], [0], [0], [1], [0, 0, 1, 1], [], []>} : vector<8x32xf32>, vector<32x128xf32>, vector<8x128xf32> -> vector<8x128xf32>
    %c0_18 = arith.constant 0 : index
    %c1_19 = arith.constant 1 : index
    %c0_20 = arith.constant 0 : index
    %37 = vector.load %arg8[%c0_18, %c1_19, %c0_20] : memref<8x8x128xf32, #tpu.memory_space<vmem>>, vector<8x1x128xf32>
    %38 = vector.shape_cast %37 : vector<8x1x128xf32> to vector<8x128xf32>
    %39 = vector.shape_cast %36 : vector<8x128xf32> to vector<8x1x128xf32>
    tpu.vector_store %arg8[%c0_18, %c1_19, %c0_20], %39 {strides = array<i32>} : memref<8x8x128xf32, #tpu.memory_space<vmem>>, vector<8x1x128xf32>,
    %c0_21 = arith.constant 0 : index
    %c2 = arith.constant 2 : index
    %c0_22 = arith.constant 0 : index
    %40 = vector.load %arg1[%c0_21, %c2, %c0_22] : memref<8x8x32xf32, #tpu.memory_space<vmem>>, vector<8x1x32xf32>
    %41 = vector.shape_cast %40 : vector<8x1x32xf32> to vector<8x32xf32>
    %cst_23 = arith.constant dense<0xFF800000> : vector<8xf32>
    %42 = vector.multi_reduction <maximumf>, %41, %cst_23 [1] : vector<8x32xf32> to vector<8xf32>
    %43 = vector.shape_cast %42 : vector<8xf32> to vector<8x1xf32>
    %44 = vector.broadcast %43 : vector<8x1xf32> to vector<8x32xf32>
    %45 = arith.subf %41, %44 : vector<8x32xf32>
    %46 = math.exp %45 : vector<8x32xf32>
    %cst_24 = arith.constant dense<0.000000e+00> : vector<8xf32>
    %47 = vector.multi_reduction <add>, %46, %cst_24 [1] : vector<8x32xf32> to vector<8xf32>
    %48 = vector.shape_cast %47 : vector<8xf32> to vector<8x1xf32>
    %49 = math.log %48 : vector<8x1xf32>
    %50 = arith.addf %43, %49 : vector<8x1xf32>
    %51 = vector.broadcast %50 : vector<8x1xf32> to vector<8x32xf32>
    %52 = arith.subf %41, %51 : vector<8x32xf32>
    %c2_25 = arith.constant 2 : index
    %c0_26 = arith.constant 0 : index
    %c0_27 = arith.constant 0 : index
    %53 = vector.load %arg2[%c2_25, %c0_26, %c0_27] : memref<8x32x128xbf16, #tpu.memory_space<vmem>>, vector<1x32x128xbf16>
    %54 = vector.shape_cast %53 : vector<1x32x128xbf16> to vector<32x128xbf16>
    %55 = arith.extf %54 : vector<32x128xbf16> to vector<32x128xf32>
    %cst_28 = arith.constant dense<0.000000e+00> : vector<8x128xf32>
    %56 = tpu.matmul %52, %55, %cst_28 {dimension_numbers = #tpu.dot_dimension_numbers<[1], [0], [0], [1], [0, 0, 1, 1], [], []>} : vector<8x32xf32>, vector<32x128xf32>, vector<8x128xf32> -> vector<8x128xf32>
    %c0_29 = arith.constant 0 : index
    %c2_30 = arith.constant 2 : index
    %c0_31 = arith.constant 0 : index
    %57 = vector.load %arg8[%c0_29, %c2_30, %c0_31] : memref<8x8x128xf32, #tpu.memory_space<vmem>>, vector<8x1x128xf32>
    %58 = vector.shape_cast %57 : vector<8x1x128xf32> to vector<8x128xf32>
    %59 = vector.shape_cast %56 : vector<8x128xf32> to vector<8x1x128xf32>
    tpu.vector_store %arg8[%c0_29, %c2_30, %c0_31], %59 {strides = array<i32>} : memref<8x8x128xf32, #tpu.memory_space<vmem>>, vector<8x1x128xf32>,
    %c0_32 = arith.constant 0 : index
    %c3 = arith.constant 3 : index
    %c0_33 = arith.constant 0 : index
    %60 = vector.load %arg1[%c0_32, %c3, %c0_33] : memref<8x8x32xf32, #tpu.memory_space<vmem>>, vector<8x1x32xf32>
    %61 = vector.shape_cast %60 : vector<8x1x32xf32> to vector<8x32xf32>
    %cst_34 = arith.constant dense<0xFF800000> : vector<8xf32>
    %62 = vector.multi_reduction <maximumf>, %61, %cst_34 [1] : vector<8x32xf32> to vector<8xf32>
    %63 = vector.shape_cast %62 : vector<8xf32> to vector<8x1xf32>
    %64 = vector.broadcast %63 : vector<8x1xf32> to vector<8x32xf32>
    %65 = arith.subf %61, %64 : vector<8x32xf32>
    %66 = math.exp %65 : vector<8x32xf32>
    %cst_35 = arith.constant dense<0.000000e+00> : vector<8xf32>
    %67 = vector.multi_reduction <add>, %66, %cst_35 [1] : vector<8x32xf32> to vector<8xf32>
    %68 = vector.shape_cast %67 : vector<8xf32> to vector<8x1xf32>
    %69 = math.log %68 : vector<8x1xf32>
    %70 = arith.addf %63, %69 : vector<8x1xf32>
    %71 = vector.broadcast %70 : vector<8x1xf32> to vector<8x32xf32>
    %72 = arith.subf %61, %71 : vector<8x32xf32>
    %c3_36 = arith.constant 3 : index
    %c0_37 = arith.constant 0 : index
    %c0_38 = arith.constant 0 : index
    %73 = vector.load %arg2[%c3_36, %c0_37, %c0_38] : memref<8x32x128xbf16, #tpu.memory_space<vmem>>, vector<1x32x128xbf16>
    %74 = vector.shape_cast %73 : vector<1x32x128xbf16> to vector<32x128xbf16>
    %75 = arith.extf %74 : vector<32x128xbf16> to vector<32x128xf32>
    %cst_39 = arith.constant dense<0.000000e+00> : vector<8x128xf32>
    %76 = tpu.matmul %72, %75, %cst_39 {dimension_numbers = #tpu.dot_dimension_numbers<[1], [0], [0], [1], [0, 0, 1, 1], [], []>} : vector<8x32xf32>, vector<32x128xf32>, vector<8x128xf32> -> vector<8x128xf32>
    %c0_40 = arith.constant 0 : index
    %c3_41 = arith.constant 3 : index
    %c0_42 = arith.constant 0 : index
    %77 = vector.load %arg8[%c0_40, %c3_41, %c0_42] : memref<8x8x128xf32, #tpu.memory_space<vmem>>, vector<8x1x128xf32>
    %78 = vector.shape_cast %77 : vector<8x1x128xf32> to vector<8x128xf32>
    %79 = vector.shape_cast %76 : vector<8x128xf32> to vector<8x1x128xf32>
    tpu.vector_store %arg8[%c0_40, %c3_41, %c0_42], %79 {strides = array<i32>} : memref<8x8x128xf32, #tpu.memory_space<vmem>>, vector<8x1x128xf32>,
    %c0_43 = arith.constant 0 : index
    %c4 = arith.constant 4 : index
    %c0_44 = arith.constant 0 : index
    %80 = vector.load %arg1[%c0_43, %c4, %c0_44] : memref<8x8x32xf32, #tpu.memory_space<vmem>>, vector<8x1x32xf32>
    %81 = vector.shape_cast %80 : vector<8x1x32xf32> to vector<8x32xf32>
    %cst_45 = arith.constant dense<0xFF800000> : vector<8xf32>
    %82 = vector.multi_reduction <maximumf>, %81, %cst_45 [1] : vector<8x32xf32> to vector<8xf32>
    %83 = vector.shape_cast %82 : vector<8xf32> to vector<8x1xf32>
    %84 = vector.broadcast %83 : vector<8x1xf32> to vector<8x32xf32>
    %85 = arith.subf %81, %84 : vector<8x32xf32>
    %86 = math.exp %85 : vector<8x32xf32>
    %cst_46 = arith.constant dense<0.000000e+00> : vector<8xf32>
    %87 = vector.multi_reduction <add>, %86, %cst_46 [1] : vector<8x32xf32> to vector<8xf32>
    %88 = vector.shape_cast %87 : vector<8xf32> to vector<8x1xf32>
    %89 = math.log %88 : vector<8x1xf32>
    %90 = arith.addf %83, %89 : vector<8x1xf32>
    %91 = vector.broadcast %90 : vector<8x1xf32> to vector<8x32xf32>
    %92 = arith.subf %81, %91 : vector<8x32xf32>
    %c4_47 = arith.constant 4 : index
    %c0_48 = arith.constant 0 : index
    %c0_49 = arith.constant 0 : index
    %93 = vector.load %arg2[%c4_47, %c0_48, %c0_49] : memref<8x32x128xbf16, #tpu.memory_space<vmem>>, vector<1x32x128xbf16>
    %94 = vector.shape_cast %93 : vector<1x32x128xbf16> to vector<32x128xbf16>
    %95 = arith.extf %94 : vector<32x128xbf16> to vector<32x128xf32>
    %cst_50 = arith.constant dense<0.000000e+00> : vector<8x128xf32>
    %96 = tpu.matmul %92, %95, %cst_50 {dimension_numbers = #tpu.dot_dimension_numbers<[1], [0], [0], [1], [0, 0, 1, 1], [], []>} : vector<8x32xf32>, vector<32x128xf32>, vector<8x128xf32> -> vector<8x128xf32>
    %c0_51 = arith.constant 0 : index
    %c4_52 = arith.constant 4 : index
    %c0_53 = arith.constant 0 : index
    %97 = vector.load %arg8[%c0_51, %c4_52, %c0_53] : memref<8x8x128xf32, #tpu.memory_space<vmem>>, vector<8x1x128xf32>
    %98 = vector.shape_cast %97 : vector<8x1x128xf32> to vector<8x128xf32>
    %99 = vector.shape_cast %96 : vector<8x128xf32> to vector<8x1x128xf32>
    tpu.vector_store %arg8[%c0_51, %c4_52, %c0_53], %99 {strides = array<i32>} : memref<8x8x128xf32, #tpu.memory_space<vmem>>, vector<8x1x128xf32>,
    %c0_54 = arith.constant 0 : index
    %c5 = arith.constant 5 : index
    %c0_55 = arith.constant 0 : index
    %100 = vector.load %arg1[%c0_54, %c5, %c0_55] : memref<8x8x32xf32, #tpu.memory_space<vmem>>, vector<8x1x32xf32>
    %101 = vector.shape_cast %100 : vector<8x1x32xf32> to vector<8x32xf32>
    %cst_56 = arith.constant dense<0xFF800000> : vector<8xf32>
    %102 = vector.multi_reduction <maximumf>, %101, %cst_56 [1] : vector<8x32xf32> to vector<8xf32>
    %103 = vector.shape_cast %102 : vector<8xf32> to vector<8x1xf32>
    %104 = vector.broadcast %103 : vector<8x1xf32> to vector<8x32xf32>
    %105 = arith.subf %101, %104 : vector<8x32xf32>
    %106 = math.exp %105 : vector<8x32xf32>
    %cst_57 = arith.constant dense<0.000000e+00> : vector<8xf32>
    %107 = vector.multi_reduction <add>, %106, %cst_57 [1] : vector<8x32xf32> to vector<8xf32>
    %108 = vector.shape_cast %107 : vector<8xf32> to vector<8x1xf32>
    %109 = math.log %108 : vector<8x1xf32>
    %110 = arith.addf %103, %109 : vector<8x1xf32>
    %111 = vector.broadcast %110 : vector<8x1xf32> to vector<8x32xf32>
    %112 = arith.subf %101, %111 : vector<8x32xf32>
    %c5_58 = arith.constant 5 : index
    %c0_59 = arith.constant 0 : index
    %c0_60 = arith.constant 0 : index
    %113 = vector.load %arg2[%c5_58, %c0_59, %c0_60] : memref<8x32x128xbf16, #tpu.memory_space<vmem>>, vector<1x32x128xbf16>
    %114 = vector.shape_cast %113 : vector<1x32x128xbf16> to vector<32x128xbf16>
    %115 = arith.extf %114 : vector<32x128xbf16> to vector<32x128xf32>
    %cst_61 = arith.constant dense<0.000000e+00> : vector<8x128xf32>
    %116 = tpu.matmul %112, %115, %cst_61 {dimension_numbers = #tpu.dot_dimension_numbers<[1], [0], [0], [1], [0, 0, 1, 1], [], []>} : vector<8x32xf32>, vector<32x128xf32>, vector<8x128xf32> -> vector<8x128xf32>
    %c0_62 = arith.constant 0 : index
    %c5_63 = arith.constant 5 : index
    %c0_64 = arith.constant 0 : index
    %117 = vector.load %arg8[%c0_62, %c5_63, %c0_64] : memref<8x8x128xf32, #tpu.memory_space<vmem>>, vector<8x1x128xf32>
    %118 = vector.shape_cast %117 : vector<8x1x128xf32> to vector<8x128xf32>
    %119 = vector.shape_cast %116 : vector<8x128xf32> to vector<8x1x128xf32>
    tpu.vector_store %arg8[%c0_62, %c5_63, %c0_64], %119 {strides = array<i32>} : memref<8x8x128xf32, #tpu.memory_space<vmem>>, vector<8x1x128xf32>,
    %c0_65 = arith.constant 0 : index
    %c6 = arith.constant 6 : index
    %c0_66 = arith.constant 0 : index
    %120 = vector.load %arg1[%c0_65, %c6, %c0_66] : memref<8x8x32xf32, #tpu.memory_space<vmem>>, vector<8x1x32xf32>
    %121 = vector.shape_cast %120 : vector<8x1x32xf32> to vector<8x32xf32>
    %cst_67 = arith.constant dense<0xFF800000> : vector<8xf32>
    %122 = vector.multi_reduction <maximumf>, %121, %cst_67 [1] : vector<8x32xf32> to vector<8xf32>
    %123 = vector.shape_cast %122 : vector<8xf32> to vector<8x1xf32>
    %124 = vector.broadcast %123 : vector<8x1xf32> to vector<8x32xf32>
    %125 = arith.subf %121, %124 : vector<8x32xf32>
    %126 = math.exp %125 : vector<8x32xf32>
    %cst_68 = arith.constant dense<0.000000e+00> : vector<8xf32>
    %127 = vector.multi_reduction <add>, %126, %cst_68 [1] : vector<8x32xf32> to vector<8xf32>
    %128 = vector.shape_cast %127 : vector<8xf32> to vector<8x1xf32>
    %129 = math.log %128 : vector<8x1xf32>
    %130 = arith.addf %123, %129 : vector<8x1xf32>
    %131 = vector.broadcast %130 : vector<8x1xf32> to vector<8x32xf32>
    %132 = arith.subf %121, %131 : vector<8x32xf32>
    %c6_69 = arith.constant 6 : index
    %c0_70 = arith.constant 0 : index
    %c0_71 = arith.constant 0 : index
    %133 = vector.load %arg2[%c6_69, %c0_70, %c0_71] : memref<8x32x128xbf16, #tpu.memory_space<vmem>>, vector<1x32x128xbf16>
    %134 = vector.shape_cast %133 : vector<1x32x128xbf16> to vector<32x128xbf16>
    %135 = arith.extf %134 : vector<32x128xbf16> to vector<32x128xf32>
    %cst_72 = arith.constant dense<0.000000e+00> : vector<8x128xf32>
    %136 = tpu.matmul %132, %135, %cst_72 {dimension_numbers = #tpu.dot_dimension_numbers<[1], [0], [0], [1], [0, 0, 1, 1], [], []>} : vector<8x32xf32>, vector<32x128xf32>, vector<8x128xf32> -> vector<8x128xf32>
    %c0_73 = arith.constant 0 : index
    %c6_74 = arith.constant 6 : index
    %c0_75 = arith.constant 0 : index
    %137 = vector.load %arg8[%c0_73, %c6_74, %c0_75] : memref<8x8x128xf32, #tpu.memory_space<vmem>>, vector<8x1x128xf32>
    %138 = vector.shape_cast %137 : vector<8x1x128xf32> to vector<8x128xf32>
    %139 = vector.shape_cast %136 : vector<8x128xf32> to vector<8x1x128xf32>
    tpu.vector_store %arg8[%c0_73, %c6_74, %c0_75], %139 {strides = array<i32>} : memref<8x8x128xf32, #tpu.memory_space<vmem>>, vector<8x1x128xf32>,
    %c0_76 = arith.constant 0 : index
    %c7 = arith.constant 7 : index
    %c0_77 = arith.constant 0 : index
    %140 = vector.load %arg1[%c0_76, %c7, %c0_77] : memref<8x8x32xf32, #tpu.memory_space<vmem>>, vector<8x1x32xf32>
    %141 = vector.shape_cast %140 : vector<8x1x32xf32> to vector<8x32xf32>
    %cst_78 = arith.constant dense<0xFF800000> : vector<8xf32>
    %142 = vector.multi_reduction <maximumf>, %141, %cst_78 [1] : vector<8x32xf32> to vector<8xf32>
    %143 = vector.shape_cast %142 : vector<8xf32> to vector<8x1xf32>
    %144 = vector.broadcast %143 : vector<8x1xf32> to vector<8x32xf32>
    %145 = arith.subf %141, %144 : vector<8x32xf32>
    %146 = math.exp %145 : vector<8x32xf32>
    %cst_79 = arith.constant dense<0.000000e+00> : vector<8xf32>
    %147 = vector.multi_reduction <add>, %146, %cst_79 [1] : vector<8x32xf32> to vector<8xf32>
    %148 = vector.shape_cast %147 : vector<8xf32> to vector<8x1xf32>
    %149 = math.log %148 : vector<8x1xf32>
    %150 = arith.addf %143, %149 : vector<8x1xf32>
    %151 = vector.broadcast %150 : vector<8x1xf32> to vector<8x32xf32>
    %152 = arith.subf %141, %151 : vector<8x32xf32>
    %c7_80 = arith.constant 7 : index
    %c0_81 = arith.constant 0 : index
    %c0_82 = arith.constant 0 : index
    %153 = vector.load %arg2[%c7_80, %c0_81, %c0_82] : memref<8x32x128xbf16, #tpu.memory_space<vmem>>, vector<1x32x128xbf16>
    %154 = vector.shape_cast %153 : vector<1x32x128xbf16> to vector<32x128xbf16>
    %155 = arith.extf %154 : vector<32x128xbf16> to vector<32x128xf32>
    %cst_83 = arith.constant dense<0.000000e+00> : vector<8x128xf32>
    %156 = tpu.matmul %152, %155, %cst_83 {dimension_numbers = #tpu.dot_dimension_numbers<[1], [0], [0], [1], [0, 0, 1, 1], [], []>} : vector<8x32xf32>, vector<32x128xf32>, vector<8x128xf32> -> vector<8x128xf32>
    %c0_84 = arith.constant 0 : index
    %c7_85 = arith.constant 7 : index
    %c0_86 = arith.constant 0 : index
    %157 = vector.load %arg8[%c0_84, %c7_85, %c0_86] : memref<8x8x128xf32, #tpu.memory_space<vmem>>, vector<8x1x128xf32>
    %158 = vector.shape_cast %157 : vector<8x1x128xf32> to vector<8x128xf32>
    %159 = vector.shape_cast %156 : vector<8x128xf32> to vector<8x1x128xf32>
    tpu.vector_store %arg8[%c0_84, %c7_85, %c0_86], %159 {strides = array<i32>} : memref<8x8x128xf32, #tpu.memory_space<vmem>>, vector<8x1x128xf32>,
    %160 = tpu.iota {dimensions = array<i32: 1>} : vector<8x128xi32>
    %c0_87 = arith.constant 0 : index
    %c0_88 = arith.constant 0 : index
    %161 = vector.load %arg3[%c0_87, %c0_88] : memref<8x128xf32, #tpu.memory_space<vmem>>, vector<8x128xf32>
    %c0_89 = arith.constant 0 : index
    %c0_90 = arith.constant 0 : index
    %162 = vector.load %arg4[%c0_89, %c0_90] : memref<8x128xf32, #tpu.memory_space<vmem>>, vector<8x128xf32>
    %c0_91 = arith.constant 0 : index
    %c0_92 = arith.constant 0 : index
    %163 = vector.load %arg5[%c0_91, %c0_92] : memref<8x1xi32, #tpu.memory_space<vmem>>, vector<8x1xi32>
    %c0_93 = arith.constant 0 : index
    %c0_94 = arith.constant 0 : index
    %c0_95 = arith.constant 0 : index
    %164 = vector.load %arg8[%c0_93, %c0_94, %c0_95] : memref<8x8x128xf32, #tpu.memory_space<vmem>>, vector<1x8x128xf32>
    %165 = vector.shape_cast %164 : vector<1x8x128xf32> to vector<8x128xf32>
    %c2_i32 = arith.constant 2 : i32
    %166 = vector.broadcast %c2_i32 : i32 to vector<8x128xi32>
    %167 = arith.cmpi slt, %160, %166 : vector<8x128xi32>
    %cst_96 = arith.constant 0.000000e+00 : f32
    %cst_97 = arith.constant -1.000000e+30 : f32
    %168 = vector.broadcast %cst_96 : f32 to vector<8x128xf32>
    %169 = vector.broadcast %cst_97 : f32 to vector<8x128xf32>
    %170 = arith.select %167, %168, %169 : vector<8x128xi1>, vector<8x128xf32>
    %171 = arith.addf %165, %170 : vector<8x128xf32>
    %c8_i32 = arith.constant 8 : i32
    %172 = arith.muli %arg0, %c8_i32 : i32
    %173 = arith.index_cast %172 : i32 to index
    %174 = memref.load %arg6[%173] : memref<8xi32, #tpu.memory_space<smem>>
    %c1_i32 = arith.constant 1 : i32
    %175 = arith.addi %172, %c1_i32 : i32
    %176 = arith.index_cast %175 : i32 to index
    %177 = memref.load %arg6[%176] : memref<8xi32, #tpu.memory_space<smem>>
    %178 = arith.maxsi %174, %177 : i32
    %c2_i32_98 = arith.constant 2 : i32
    %179 = arith.addi %172, %c2_i32_98 : i32
    %180 = arith.index_cast %179 : i32 to index
    %181 = memref.load %arg6[%180] : memref<8xi32, #tpu.memory_space<smem>>
    %182 = arith.maxsi %178, %181 : i32
    %c3_i32 = arith.constant 3 : i32
    %183 = arith.addi %172, %c3_i32 : i32
    %184 = arith.index_cast %183 : i32 to index
    %185 = memref.load %arg6[%184] : memref<8xi32, #tpu.memory_space<smem>>
    %186 = arith.maxsi %182, %185 : i32
    %c4_i32 = arith.constant 4 : i32
    %187 = arith.addi %172, %c4_i32 : i32
    %188 = arith.index_cast %187 : i32 to index
    %189 = memref.load %arg6[%188] : memref<8xi32, #tpu.memory_space<smem>>
    %190 = arith.maxsi %186, %189 : i32
    %c5_i32 = arith.constant 5 : i32
    %191 = arith.addi %172, %c5_i32 : i32
    %192 = arith.index_cast %191 : i32 to index
    %193 = memref.load %arg6[%192] : memref<8xi32, #tpu.memory_space<smem>>
    %194 = arith.maxsi %190, %193 : i32
    %c6_i32 = arith.constant 6 : i32
    %195 = arith.addi %172, %c6_i32 : i32
    %196 = arith.index_cast %195 : i32 to index
    %197 = memref.load %arg6[%196] : memref<8xi32, #tpu.memory_space<smem>>
    %198 = arith.maxsi %194, %197 : i32
    %c7_i32 = arith.constant 7 : i32
    %199 = arith.addi %172, %c7_i32 : i32
    %200 = arith.index_cast %199 : i32 to index
    %201 = memref.load %arg6[%200] : memref<8xi32, #tpu.memory_space<smem>>
    %202 = arith.maxsi %198, %201 : i32
    %c8_i32_99 = arith.constant 8 : i32
    %203 = arith.minsi %202, %c8_i32_99 : i32
    %c1_i32_100 = arith.constant 1 : i32
    %204 = arith.subi %203, %c1_i32_100 : i32
    %205 = arith.addi %c1_i32_100, %204 : i32
    %c1_i32_101 = arith.constant 1 : i32
    %206 = scf.for %arg9 = %c1_i32_100 to %205 step %c1_i32_101 iter_args(%arg10 = %171) -> (vector<8x128xf32>)  : i32 {
      %c1_i32_107 = arith.constant 1 : i32
      %220 = tpu.dynamic_rotate %arg10 by %c1_i32_107 dim 1 : vector<8x128xf32>, i32 -> vector<8x128xf32>
      %c1_i32_108 = arith.constant 1 : i32
      %221 = vector.broadcast %c1_i32_108 : i32 to vector<8x128xi32>
      %222 = arith.cmpi sge, %160, %221 : vector<8x128xi32>
      %cst_109 = arith.constant -1.000000e+30 : f32
      %223 = vector.broadcast %cst_109 : f32 to vector<8x128xf32>
      %224 = arith.select %222, %220, %223 : vector<8x128xi1>, vector<8x128xf32>
      %c2_i32_110 = arith.constant 2 : i32
      %225 = tpu.dynamic_rotate %arg10 by %c2_i32_110 dim 1 : vector<8x128xf32>, i32 -> vector<8x128xf32>
      %c2_i32_111 = arith.constant 2 : i32
      %226 = vector.broadcast %c2_i32_111 : i32 to vector<8x128xi32>
      %227 = arith.cmpi sge, %160, %226 : vector<8x128xi32>
      %cst_112 = arith.constant -1.000000e+30 : f32
      %228 = vector.broadcast %cst_112 : f32 to vector<8x128xf32>
      %229 = arith.select %227, %225, %228 : vector<8x128xi1>, vector<8x128xf32>
      %230 = arith.addf %229, %161 : vector<8x128xf32>
      %231 = arith.maximumf %arg10, %224 : vector<8x128xf32>
      %232 = arith.maximumf %231, %230 : vector<8x128xf32>
      %233 = arith.subf %arg10, %232 : vector<8x128xf32>
      %234 = math.exp %233 : vector<8x128xf32>
      %235 = arith.subf %224, %232 : vector<8x128xf32>
      %236 = math.exp %235 : vector<8x128xf32>
      %237 = arith.addf %234, %236 : vector<8x128xf32>
      %238 = arith.subf %230, %232 : vector<8x128xf32>
      %239 = math.exp %238 : vector<8x128xf32>
      %240 = arith.addf %237, %239 : vector<8x128xf32>
      %241 = math.log %240 : vector<8x128xf32>
      %242 = arith.addf %232, %241 : vector<8x128xf32>
      %243 = arith.index_cast %arg9 : i32 to index
      %c0_113 = arith.constant 0 : index
      %c0_114 = arith.constant 0 : index
      %244 = vector.load %arg8[%243, %c0_113, %c0_114] : memref<8x8x128xf32, #tpu.memory_space<vmem>>, vector<1x8x128xf32>
      %245 = vector.shape_cast %244 : vector<1x8x128xf32> to vector<8x128xf32>
      %246 = arith.addf %242, %245 : vector<8x128xf32>
      %cst_115 = arith.constant -1.000000e+30 : f32
      %247 = vector.broadcast %cst_115 : f32 to vector<8x128xf32>
      %248 = arith.maximumf %246, %247 : vector<8x128xf32>
      %249 = vector.broadcast %arg9 : i32 to vector<8x1xi32>
      %250 = arith.cmpi slt, %249, %163 : vector<8x1xi32>
      %251 = vector.shape_cast %250 : vector<8x1xi1> to vector<8x1xi1>
      %252 = vector.broadcast %251 : vector<8x1xi1> to vector<8x128xi1>
      %253 = arith.select %252, %248, %arg10 : vector<8x128xi1>, vector<8x128xf32>
      scf.yield %253 : vector<8x128xf32>
    }
    %207 = arith.addf %206, %162 : vector<8x128xf32>
    %cst_102 = arith.constant dense<0xFF800000> : vector<8xf32>
    %208 = vector.multi_reduction <maximumf>, %207, %cst_102 [1] : vector<8x128xf32> to vector<8xf32>
    %209 = vector.shape_cast %208 : vector<8xf32> to vector<8x1xf32>
    %210 = vector.broadcast %209 : vector<8x1xf32> to vector<8x128xf32>
    %211 = arith.subf %207, %210 : vector<8x128xf32>
    %212 = math.exp %211 : vector<8x128xf32>
    %cst_103 = arith.constant dense<0.000000e+00> : vector<8xf32>
    %213 = vector.multi_reduction <add>, %212, %cst_103 [1] : vector<8x128xf32> to vector<8xf32>
    %214 = vector.shape_cast %213 : vector<8xf32> to vector<8x1xf32>
    %215 = math.log %214 : vector<8x1xf32>
    %216 = arith.addf %209, %215 : vector<8x1xf32>
    %cst_104 = arith.constant 0.000000e+00 : f32
    %217 = vector.broadcast %cst_104 : f32 to vector<8x1xf32>
    %218 = arith.subf %217, %216 : vector<8x1xf32>
    %c0_105 = arith.constant 0 : index
    %c0_106 = arith.constant 0 : index
    %219 = vector.load %arg7[%c0_105, %c0_106] : memref<8x1xf32, #tpu.memory_space<vmem>>, vector<8x1xf32>
    tpu.vector_store %arg7[%c0_105, %c0_106], %218 {strides = array<i32>} : memref<8x1xf32, #tpu.memory_space<vmem>>, vector<8x1xf32>,
    return
  }
  func.func @transform_0(%arg0: i32) -> (i32, i32, i32) {
    %c0_i32 = arith.constant 0 : i32
    %c0_i32_0 = arith.constant 0 : i32
    %c0_i32_1 = arith.constant 0 : i32
    return %c0_i32, %arg0, %c0_i32_0 : i32, i32, i32
  }
  func.func @transform_1(%arg0: i32) -> (i32, i32, i32) {
    %c0_i32 = arith.constant 0 : i32
    %c0_i32_0 = arith.constant 0 : i32
    %c0_i32_1 = arith.constant 0 : i32
    return %arg0, %c0_i32, %c0_i32_0 : i32, i32, i32
  }
  func.func @transform_2(%arg0: i32) -> (i32, i32) {
    %c0_i32 = arith.constant 0 : i32
    %c0_i32_0 = arith.constant 0 : i32
    return %arg0, %c0_i32 : i32, i32
  }
  func.func @transform_3(%arg0: i32) -> (i32, i32) {
    %c0_i32 = arith.constant 0 : i32
    %c0_i32_0 = arith.constant 0 : i32
    return %arg0, %c0_i32 : i32, i32
  }
  func.func @transform_4(%arg0: i32) -> (i32, i32) {
    %c0_i32 = arith.constant 0 : i32
    %c0_i32_0 = arith.constant 0 : i32
    return %arg0, %c0_i32 : i32, i32
  }
  func.func @transform_5(%arg0: i32) -> i32 {
    %c0_i32 = arith.constant 0 : i32
    %c0_i32_0 = arith.constant 0 : i32
    return %c0_i32 : i32
  }
  func.func @transform_6(%arg0: i32) -> (i32, i32) {
    %c0_i32 = arith.constant 0 : i32
    %c0_i32_0 = arith.constant 0 : i32
    return %arg0, %c0_i32 : i32, i32
  }
}

</mosaic_0001>

<bundles_post_ra>
// kernel: tpu_custom_call.1
= control target key start
LH: loop header
LB: loop body
LE: loop exit
PB: predicated region body
PF: predicated region fallthrough
CT: control target
= control target key end

     0   :  { %11 = vsyncpa [#allocation4], 0  ;;  %s3972_s0 = inlined_call_operand.hbm [shape: f32[8,8,32], index: 0, kind: input, shape index: {}]   ;;  %s3973_s1 = inlined_call_operand.hbm [shape: bf16[8,32,128], index: 1, kind: input, shape index: {}]   ;;  %s3974_s2 = inlined_call_operand.vmem [shape: f32[8,128], index: 2, kind: input, shape index: {}]   ;;  %s3975_s3 = inlined_call_operand.vmem [shape: f32[8,128], index: 3, kind: input, shape index: {}]   ;;  %s3976_s4 = inlined_call_operand.vmem [shape: s32[8,1], index: 4, kind: input, shape index: {}]   ;;  %s3977_s5 = inlined_call_operand.vmem [shape: s32[8], index: 5, kind: input, shape index: {}]   ;;  %s3978_s6 = inlined_call_operand.vmem [shape: f32[8,1], index: 6, kind: output, shape index: {}]  }
   0x1   :  { %12 = vsyncpa [#allocation7], 0 }
   0x2   :  { %13 = vsyncpa [#allocation5], 0  ;;  %s3203_s21 = smov [#allocation3]   ;;  %s3117_s25 = scalar_lea.hbm %s3972_s0, 1024 }
   0x3   :  { %s19_s22 = sshll.u32 %s3203_s21, 4  ;;  %p3118_p0 = scmp.ne.s32.totalorder %s3972_s0, %s3117_s25  ;;  %s20_s22 = int_to_ptr.vmem [resolvable:$true] %s19_s22 }
   0x4   :  { %p3121_p1 = scmp.lt.u32.totalorder %s3117_s25, %s3972_s0 }
   0x6   :  { %p3123_p2 = pnand %p3121_p1, %p3118_p0 }
   0x8   :  { %3126 = shalt.err (!%p3123_p2)
}
   0x9   :  { %s3127_s30 = scalar_lea.vmem %s20_s22, 1024  ;;  %p3132_p4 = scmp.lt.s32.totalorder %s20_s22, %s20_s22 }
   0xa   :  { %p3128_p3 = scmp.ne.s32.totalorder %s20_s22, %s3127_s30  ;;  %p3133_p5 = scmp.lt.s32.totalorder %s3127_s30, %s3127_s30 }
   0xc   :  { %p3134_p6 = por %p3133_p5, %p3132_p4 }
   0xe   :  { %p3135_p7 = pnand %p3134_p6, %p3128_p3 }
  0x10   :  { %3138 = shalt.err (!%p3135_p7)
}
  0x11   :  { %s3204_s7 = smov 128   ;;  %s3205_s8 = smov 8  }
  0x12   :  { %25 = dma.hbm_to_vmem [thread:$0]  %s3972_s0, 1024, %s20_s22, [#allocation4], %s3204_s7, %s3204_s7, %s3205_s8  }
  0x13   :  { %s3206_s11 = smov [#allocation6]   ;;  %s3139_s15 = scalar_lea.hbm %s3973_s1, 2048 }
  0x14   :  { %s31_s12 = sshll.u32 %s3206_s11, 4  ;;  %p3140_p8 = scmp.ne.s32.totalorder %s3973_s1, %s3139_s15  ;;  %s32_s12 = int_to_ptr.vmem [resolvable:$true] %s31_s12 }
  0x15   :  { %p3143_p9 = scmp.lt.u32.totalorder %s3139_s15, %s3973_s1 }
  0x17   :  { %p3145_p10 = pnand %p3143_p9, %p3140_p8 }
  0x19   :  { %3148 = shalt.err (!%p3145_p10)
}
  0x1a   :  { %s3149_s20 = scalar_lea.vmem %s32_s12, 2048  ;;  %p3154_p12 = scmp.lt.s32.totalorder %s32_s12, %s32_s12 }
  0x1b   :  { %p3150_p11 = scmp.ne.s32.totalorder %s32_s12, %s3149_s20  ;;  %p3155_p13 = scmp.lt.s32.totalorder %s3149_s20, %s3149_s20 }
  0x1d   :  { %p3156_p0 = por %p3155_p13, %p3154_p12 }
  0x1f   :  { %p3157_p1 = pnand %p3156_p0, %p3150_p11 }
  0x21   :  { %3160 = shalt.err (!%p3157_p1)
}
  0x22   :  { %s3207_s0 = smov 64   ;;  %s3208_s21 = smov 4  }
  0x23   :  { %37 = dma.hbm_to_vmem [thread:$0]  %s3973_s1, 2048, %s32_s12, [#allocation7], %s3207_s0, %s3207_s0, %s3208_s21  }
  0x24   :  { %s50_s26 = sshll.u32 %s3977_s5, 4  ;;  %s51_s26 = int_to_ptr.vmem [resolvable:$true] %s50_s26 }
  0x25   :  { %s3161_s27 = scalar_lea.vmem %s51_s26, 16  ;;  %p3166_p3 = scmp.lt.s32.totalorder %s51_s26, %s51_s26 }
  0x26   :  { %p3162_p2 = scmp.ne.s32.totalorder %s51_s26, %s3161_s27  ;;  %p3167_p4 = scmp.lt.s32.totalorder %s3161_s27, %s3161_s27 }
  0x28   :  { %p3168_p5 = por %p3167_p4, %p3166_p3 }
  0x2a   :  { %p3169_p6 = pnand %p3168_p5, %p3162_p2 }
  0x2c   :  { %3172 = shalt.err (!%p3169_p6)
}
  0x2d   :  { %s3209_s28 = smov [#allocation8]  }
  0x2e   :  { %53 = dma.vmem_to_smem %s51_s26, 16, %s3209_s28, [#allocation5]  }
  0x2f   :  { %3185 = dma.done.wait [#allocation4], 1024  }
  0x30   :  { %3186 = vsyncadd [#allocation4], 4294966272 }
  0x31   :  { %3187 = dma.done.wait [#allocation7], 2048  }
  0x32   :  { %3188 = vsyncadd [#allocation7], 4294965248 }
  0x33   :  { %3189 = dma.done.wait [#allocation5], 16  }
  0x34   :  { %3190 = vsyncadd [#allocation5], 4294967280 }
  0x35   :  { %63 = sfence }
  0x36   :  { %v3280_v0 = vld [vmem:[#allocation3] sm:$0x1]  ;;  %v3282_v1 = vld [vmem:[#allocation3 + $0x8] sm:$0x1]  ;;  %v3284_v2 = vld [vmem:[#allocation3 + $0x10] sm:$0x1] }
  0x37   :  { %v3286_v3 = vld [vmem:[#allocation3 + $0x18] sm:$0x1]  ;;  %v3288_v4 = vld [vmem:[#allocation3 + $0x20] sm:$0x1]  ;;  %v3290_v5 = vld [vmem:[#allocation3 + $0x28] sm:$0x1] }
  0x38   :  { %v3292_v6 = vld [vmem:[#allocation3 + $0x30] sm:$0x1]  ;;  %v80_v7 = vrot.slane %v3282_v1, 7  ;;  %vm81_vm0 = vcmask 1041409   ;;  %v3295_v8 = vld [vmem:[#allocation3 + $0x38] sm:$0x1] }
  0x39   :  { %v83_v9 = vrot.slane %v3284_v2, 6  ;;  %vm84_vm1 = vcmask 1042434   ;;  %v86_v10 = vrot.slane %v3286_v3, 5  ;;  %vm87_vm2 = vcmask 1043459   ;;  %v3303_v14 = vld [vmem:[#allocation3 + $0xa] sm:$0x1] }
  0x3a   :  { %v82_v11 = vsel %vm81_vm0, %v80_v7, %v3280_v0  ;;  %v89_v12 = vrot.slane %v3288_v4, 4  ;;  %vm90_vm3 = vcmask 1044484   ;;  %v92_v13 = vrot.slane %v3290_v5, 3  ;;  %v3307_v17 = vld [vmem:[#allocation3 + $0x2] sm:$0x1]  ;;  %s2449_s1 = sld [smem:[#allocation8]] }
  0x3b   :  { %v85_v15 = vsel %vm84_vm1, %v83_v9, %v82_v11  ;;  %vm93_vm4 = vcmask 1045509   ;;  %v95_v16 = vrot.slane %v3292_v6, 2  ;;  %vm96_vm5 = vcmask 1046534   ;;  %v3309_v18 = vld [vmem:[#allocation3 + $0x12] sm:$0x1]  ;;  %s2596_s5 = sld [smem:[#allocation8 + $0x1]] }
  0x3c   :  { %v88_v19 = vsel %vm87_vm2, %v86_v10, %v85_v15  ;;  %v98_v20 = vrot.slane %v3295_v8, 1  ;;  %vm99_vm6 = vcmask 1047559   ;;  %vm102_vm7 = vcmask 261120   ;;  %v3313_v21 = vld [vmem:[#allocation3 + $0x1a] sm:$0x1]  ;;  %s2597_s29 = sld [smem:[#allocation8 + $0x2]] }
  0x3d   :  { %v91_v22 = vsel %vm90_vm3, %v89_v12, %v88_v19  ;;  %v3316_v23 = vld [vmem:[#allocation3 + $0x22] sm:$0x1]  ;;  %v3318_v24 = vld [vmem:[#allocation3 + $0x2a] sm:$0x1]  ;;  %v3320_v25 = vld [vmem:[#allocation3 + $0x32] sm:$0x1] }
  0x3e   :  { %v94_v26 = vsel %vm93_vm4, %v92_v13, %v91_v22  ;;  %v3323_v27 = vld [vmem:[#allocation3 + $0x3a] sm:$0x1]  ;;  %v679_v28 = vrot.slane %v3303_v14, 7  ;;  %v681_v29 = vrot.slane %v3309_v18, 6  ;;  %v683_v30 = vrot.slane %v3313_v21, 5  ;;  %s2598_s30 = sld [smem:[#allocation8 + $0x3]] }
  0x3f   :  { %v97_v31 = vsel %vm96_vm5, %v95_v16, %v94_v26  ;;  %v685_v32 = vrot.slane %v3316_v23, 4  ;;  %v687_v33 = vrot.slane %v3318_v24, 3  ;;  %v3331_v34 = vld [vmem:[#allocation3 + $0x1] sm:$0x1]  ;;  %v689_v37 = vrot.slane %v3320_v25, 2  ;;  %s2599_s7 = sld [smem:[#allocation8 + $0x4]] }
  0x40   :  { %v100_v35 = vsel %vm99_vm6, %v98_v20, %v97_v31  ;;  %v680_v36 = vsel %vm81_vm0, %v679_v28, %v3307_v17  ;;  %v691_v38 = vrot.slane %v3323_v27, 1  ;;  %v3338_v39 = vld [vmem:[#allocation3 + $0x9] sm:$0x1]  ;;  %v3340_v40 = vld [vmem:[#allocation3 + $0x11] sm:$0x1]  ;;  %vm3211_vm8 = vmmov 0  }
  0x41   :  { %v103_v41 = vsel %vm102_vm7, %v100_v35, -inf  ;;  %v682_v42 = vsel %vm84_vm1, %v681_v29, %v680_v36  ;;  %v3344_v43 = vld [vmem:[#allocation3 + $0x19] sm:$0x1]  ;;  %v3346_v44 = vld [vmem:[#allocation3 + $0x21] sm:$0x1]  ;;  %v383_v45 = vrot.slane %v3338_v39, 7  ;;  %p2452_p7 = scmp.gt.s32.totalorder %s2449_s1, %s2596_s5 }
  0x42   :  { %104 = vmax.xlane.f32.xlu0 %v103_v41  ;;  %v684_v46 = vsel %vm87_vm2, %v683_v30, %v682_v42  ;;  %v3350_v47 = vld [vmem:[#allocation3 + $0x29] sm:$0x1]  ;;  %v3352_v48 = vld [vmem:[#allocation3 + $0x31] sm:$0x1]  ;;  %v3354_v49 = vld [vmem:[#allocation3 + $0x39] sm:$0x1] }
  0x43   :  { %v686_v50 = vsel %vm90_vm3, %v685_v32, %v684_v46  ;;  %v384_v51 = vsel %vm81_vm0, %v383_v45, %v3331_v34  ;;  %v385_v52 = vrot.slane %v3340_v40, 6  ;;  %v387_v53 = vrot.slane %v3344_v43, 5  ;;  %v3361_v54 = vld [vmem:[#allocation3 + $0x3] sm:$0x1]  ;;  %v3363_v55 = vld [vmem:[#allocation3 + $0xb] sm:$0x1]  ;;  %s4040_s1 = smov (!%p2452_p7, %s2449_s1), %s2596_s5 }
  0x44   :  { %v688_v56 = vsel %vm93_vm4, %v687_v33, %v686_v50  ;;  %v389_v57 = vrot.slane %v3346_v44, 4  ;;  %v391_v58 = vrot.slane %v3350_v47, 3  ;;  %v393_v59 = vrot.slane %v3352_v48, 2  ;;  %v3369_v60 = vld [vmem:[#allocation3 + $0x13] sm:$0x1]  ;;  %p2456_p8 = scmp.gt.s32.totalorder %s4040_s1, %s2597_s29  ;;  %s2600_s8 = sld [smem:[#allocation8 + $0x5]] }
  0x45   :  { %v690_v61 = vsel %vm96_vm5, %v689_v37, %v688_v56  ;;  %v386_v62 = vsel %vm84_vm1, %v385_v52, %v384_v51  ;;  %v395_v63 = vrot.slane %v3354_v49, 1  ;;  %v3374_v7 = vld [vmem:[#allocation3 + $0x1b] sm:$0x1]  ;;  %v3376_v9 = vld [vmem:[#allocation3 + $0x23] sm:$0x1]  ;;  %v975_v10 = vrot.slane %v3363_v55, 7 }
  0x46   :  { %v692_v11 = vsel %vm99_vm6, %v691_v38, %v690_v61  ;;  %v388_v12 = vsel %vm87_vm2, %v387_v53, %v386_v62  ;;  %v3381_v13 = vld [vmem:[#allocation3 + $0x2b] sm:$0x1]  ;;  %v3383_v15 = vld [vmem:[#allocation3 + $0x33] sm:$0x1]  ;;  %v3385_v16 = vld [vmem:[#allocation3 + $0x3b] sm:$0x1]  ;;  %s4042_s1 = smov (!%p2456_p8, %s4040_s1), %s2597_s29 }
  0x47   :  { %v694_v19 = vsel %vm102_vm7, %v692_v11, -inf  ;;  %v390_v20 = vsel %vm90_vm3, %v389_v57, %v388_v12  ;;  %v976_v22 = vsel %vm81_vm0, %v975_v10, %v3361_v54  ;;  %v977_v26 = vrot.slane %v3369_v60, 6  ;;  %v3392_v28 = vld [vmem:[#allocation3 + $0xc] sm:$0x1]  ;;  %v3398_v33 = vld [vmem:[#allocation3 + $0x4] sm:$0x1]  ;;  %p2460_p9 = scmp.gt.s32.totalorder %s4042_s1, %s2598_s30 }
  0x48   :  { %695 = vmax.xlane.f32.xlu1 %v694_v19  ;;  %v392_v29 = vsel %vm93_vm4, %v391_v58, %v390_v20  ;;  %v979_v30 = vrot.slane %v3374_v7, 5  ;;  %v981_v31 = vrot.slane %v3376_v9, 4  ;;  %v983_v32 = vrot.slane %v3381_v13, 3  ;;  %v3400_v35 = vld [vmem:[#allocation3 + $0x14] sm:$0x1]  ;;  %s2601_s9 = sld [smem:[#allocation8 + $0x6]] }
  0x49   :  { %v394_v36 = vsel %vm96_vm5, %v393_v59, %v392_v29  ;;  %v978_v37 = vsel %vm84_vm1, %v977_v26, %v976_v22  ;;  %v985_v38 = vrot.slane %v3383_v15, 2  ;;  %v987_v41 = vrot.slane %v3385_v16, 1  ;;  %v3406_v42 = vld [vmem:[#allocation3 + $0x1c] sm:$0x1]  ;;  %v3408_v45 = vld [vmem:[#allocation3 + $0x24] sm:$0x1]  ;;  %s4044_s1 = smov (!%p2460_p9, %s4042_s1), %s2598_s30 }
  0x4a   :  { %v396_v46 = vsel %vm99_vm6, %v395_v63, %v394_v36  ;;  %v980_v50 = vsel %vm87_vm2, %v979_v30, %v978_v37  ;;  %v3412_v51 = vld [vmem:[#allocation3 + $0x2c] sm:$0x1]  ;;  %v3414_v52 = vld [vmem:[#allocation3 + $0x34] sm:$0x1]  ;;  %v3416_v53 = vld [vmem:[#allocation3 + $0x3c] sm:$0x1]  ;;  %p2464_p10 = scmp.gt.s32.totalorder %s4044_s1, %s2599_s7 }
  0x4b   :  { %3999 = vst [vmem:[#allocation12_spill] sm:$0xff] %v3414_v52  ;;  %4000 = vst [vmem:[#allocation13_spill] sm:$0xff] %v3416_v53  ;;  %v398_v56 = vsel %vm102_vm7, %v396_v46, -inf  ;;  %v982_v57 = vsel %vm90_vm3, %v981_v31, %v980_v50  ;;  %v1271_v58 = vrot.slane %v3392_v28, 7  ;;  %v1273_v59 = vrot.slane %v3400_v35, 6  ;;  %s2602_s16 = sld [smem:[#allocation8 + $0x7]] }
  0x4c   :  { %399 = vmax.xlane.f32.xlu0 %v398_v56  ;;  %v984_v61 = vsel %vm93_vm4, %v983_v32, %v982_v57  ;;  %v1275_v62 = vrot.slane %v3406_v42, 5  ;;  %v1277_v63 = vrot.slane %v3408_v45, 4  ;;  %v1279_v10 = vrot.slane %v3412_v51, 3  ;;  %v3426_v11 = vld [vmem:[#allocation3 + $0x5] sm:$0x1]  ;;  %s4046_s1 = smov (!%p2464_p10, %s4044_s1), %s2599_s7 }
  0x4d   :  { %v3428_v12 = vld [vmem:[#allocation3 + $0xd] sm:$0x1]  ;;  %v986_v19 = vsel %vm96_vm5, %v985_v38, %v984_v61  ;;  %v1272_v20 = vsel %vm81_vm0, %v1271_v58, %v3398_v33  ;;  %v1281_v22 = vrot.slane %v3414_v52, 2  ;;  %v1283_v26 = vrot.slane %v3416_v53, 1  ;;  %v3435_v29 = vld [vmem:[#allocation3 + $0x15] sm:$0x1]  ;;  %p2468_p11 = scmp.gt.s32.totalorder %s4046_s1, %s2600_s8 }
  0x4e   :  { %4001 = vst [vmem:[#allocation14_spill] sm:$0xff] %v3428_v12  ;;  %4002 = vst [vmem:[#allocation15_spill] sm:$0xff] %v3435_v29  ;;  %v3437_v30 = vld [vmem:[#allocation3 + $0x1d] sm:$0x1]  ;;  %v988_v31 = vsel %vm99_vm6, %v987_v41, %v986_v19  ;;  %v1274_v32 = vsel %vm84_vm1, %v1273_v59, %v1272_v20  ;;  %v3441_v36 = vld [vmem:[#allocation3 + $0x25] sm:$0x1] }
  0x4f   :  { %4003 = vst [vmem:[#allocation16_spill] sm:$0xff] %v3437_v30  ;;  %4004 = vst [vmem:[#allocation17_spill] sm:$0xff] %v3441_v36  ;;  %v3443_v37 = vld [vmem:[#allocation3 + $0x2d] sm:$0x1]  ;;  %v3445_v38 = vld [vmem:[#allocation3 + $0x35] sm:$0x1]  ;;  %v1276_v50 = vsel %vm87_vm2, %v1275_v62, %v1274_v32  ;;  %s4048_s1 = smov (!%p2468_p11, %s4046_s1), %s2600_s8 }
  0x50   :  { %4005 = vst [vmem:[#allocation18_spill] sm:$0xff] %v3443_v37  ;;  %4006 = vst [vmem:[#allocation19_spill] sm:$0xff] %v3445_v38  ;;  %v990_v46 = vsel %vm102_vm7, %v988_v31, -inf  ;;  %v3449_v56 = vld [vmem:[#allocation3 + $0x3d] sm:$0x1]  ;;  %v1567_v57 = vrot.slane %v3428_v12, 7  ;;  %v1278_v41 = vsel %vm90_vm3, %v1277_v63, %v1276_v50  ;;  %p2472_p12 = scmp.gt.s32.totalorder %s4048_s1, %s2601_s9 }
  0x51   :  { %4007 = vst [vmem:[#allocation20_spill] sm:$0xff] %v3449_v56  ;;  %v1569_v58 = vrot.slane %v3435_v29, 6  ;;  %991 = vmax.xlane.f32.xlu1 %v990_v46  ;;  %v1571_v59 = vrot.slane %v3437_v30, 5  ;;  %v1573_v61 = vrot.slane %v3441_v36, 4  ;;  %v1575_v19 = vrot.slane %v3443_v37, 3 }
  0x52   :  { %v3457_v20 = vld [vmem:[#allocation3 + $0x6] sm:$0x1]  ;;  %v1280_v31 = vsel %vm93_vm4, %v1279_v10, %v1278_v41  ;;  %v1568_v62 = vsel %vm81_vm0, %v1567_v57, %v3426_v11  ;;  %v1577_v32 = vrot.slane %v3445_v38, 2  ;;  %v1579_v29 = vrot.slane %v3449_v56, 1  ;;  %v3464_v46 = vld [vmem:[#allocation3 + $0xe] sm:$0x1]  ;;  %s4050_s1 = smov (!%p2472_p12, %s4048_s1), %s2601_s9 }
  0x53   :  { %4008 = vst [vmem:[#allocation21_spill] sm:$0xff] %v3464_v46  ;;  %v3466_v63 = vld [vmem:[#allocation3 + $0x16] sm:$0x1]  ;;  %v1282_v50 = vsel %vm96_vm5, %v1281_v22, %v1280_v31  ;;  %v1570_v36 = vsel %vm84_vm1, %v1569_v58, %v1568_v62  ;;  %v3470_v37 = vld [vmem:[#allocation3 + $0x1e] sm:$0x1]  ;;  %v1863_v12 = vrot.slane %v3464_v46, 7  ;;  %p2476_p13 = scmp.gt.s32.totalorder %s4050_s1, %s2602_s16 }
  0x54   :  { %4009 = vst [vmem:[#allocation22_spill] sm:$0xff] %v3466_v63  ;;  %4010 = vst [vmem:[#allocation23_spill] sm:$0xff] %v3470_v37  ;;  %v3472_v30 = vld [vmem:[#allocation3 + $0x26] sm:$0x1]  ;;  %v3474_v10 = vld [vmem:[#allocation3 + $0x2e] sm:$0x1]  ;;  %v1284_v57 = vsel %vm99_vm6, %v1283_v26, %v1282_v50  ;;  %v1572_v41 = vsel %vm87_vm2, %v1571_v59, %v1570_v36 }
  0x55   :  { %4011 = vst [vmem:[#allocation24_spill] sm:$0xff] %v3472_v30  ;;  %4012 = vst [vmem:[#allocation25_spill] sm:$0xff] %v3474_v10  ;;  %v3478_v38 = vld [vmem:[#allocation3 + $0x36] sm:$0x1]  ;;  %v3480_v56 = vld [vmem:[#allocation3 + $0x3e] sm:$0x1]  ;;  %v1574_v31 = vsel %vm90_vm3, %v1573_v61, %v1572_v41  ;;  %v1864_v36 = vsel %vm81_vm0, %v1863_v12, %v3457_v20  ;;  %s4052_s1 = smov (!%p2476_p13, %s4050_s1), %s2602_s16 }
  0x56   :  { %4013 = vst [vmem:[#allocation26_spill] sm:$0xff] %v3480_v56  ;;  %v1865_v22 = vrot.slane %v3466_v63, 6  ;;  %v1286_v58 = vsel %vm102_vm7, %v1284_v57, -inf  ;;  %v1867_v62 = vrot.slane %v3470_v37, 5  ;;  %v1869_v53 = vrot.slane %v3472_v30, 4  ;;  %p2478_p0 = scmp.lt.s32.totalorder %s4052_s1, 8 }
  0x57   :  { %v3488_v52 = vld [vmem:[#allocation3 + $0x7] sm:$0x1]  ;;  %1287 = vmax.xlane.f32.xlu0 %v1286_v58  ;;  %v1576_v26 = vsel %vm93_vm4, %v1575_v19, %v1574_v31  ;;  %v1871_v59 = vrot.slane %v3474_v10, 3  ;;  %v3494_v50 = vld [vmem:[#allocation3 + $0xf] sm:$0x1]  ;;  %v1873_v41 = vrot.slane %v3478_v38, 2 }
  0x58   :  { %4014 = vst [vmem:[#allocation27_spill] sm:$0xff] %v3494_v50  ;;  %v3496_v63 = vld [vmem:[#allocation3 + $0x17] sm:$0x1]  ;;  %v1578_v61 = vsel %vm96_vm5, %v1577_v32, %v1576_v26  ;;  %v1866_v57 = vsel %vm84_vm1, %v1865_v22, %v1864_v36  ;;  %v3501_v30 = vld [vmem:[#allocation3 + $0x1f] sm:$0x1]  ;;  %v2159_v19 = vrot.slane %v3494_v50, 7 }
  0x59   :  { %v3503_v58 = vld [vmem:[#allocation3 + $0x27] sm:$0x1]  ;;  %v1580_v12 = vsel %vm99_vm6, %v1579_v29, %v1578_v61  ;;  %v1868_v31 = vsel %vm87_vm2, %v1867_v62, %v1866_v57  ;;  %v1875_v10 = vrot.slane %v3480_v56, 1  ;;  %v3509_v37 = vld [vmem:[#allocation3 + $0x2f] sm:$0x1]  ;;  %v2161_v50 = vrot.slane %v3496_v63, 6 }
  0x5a   :  { %4015 = vst [vmem:[#allocation28_spill] sm:$0xff] %v3503_v58  ;;  %4016 = vst [vmem:[#allocation29_spill] sm:$0xff] %v3509_v37  ;;  %v3511_v46 = vld [vmem:[#allocation3 + $0x37] sm:$0x1]  ;;  %v1582_v32 = vsel %vm102_vm7, %v1580_v12, -inf  ;;  %v1870_v22 = vsel %vm90_vm3, %v1869_v53, %v1868_v31  ;;  %v2160_v36 = vsel %vm81_vm0, %v2159_v19, %v3488_v52  ;;  %v2163_v62 = vrot.slane %v3501_v30, 5 }
  0x5b   :  { %v3515_v26 = vld [vmem:[#allocation3 + $0x3f] sm:$0x1]  ;;  %1583 = vmax.xlane.f32.xlu1 %v1582_v32  ;;  %v1872_v29 = vsel %vm93_vm4, %v1871_v59, %v1870_v22  ;;  %v2165_v61 = vrot.slane %v3503_v58, 4  ;;  %v2167_v57 = vrot.slane %v3509_v37, 3  ;;  %v2162_v53 = vsel %vm84_vm1, %v2161_v50, %v2160_v36  ;;  %p2605_p1 = scmp.le.s32.totalorder %s4052_s1, 1 }
  0x5c   :  { %4017 = vst [vmem:[#allocation30_spill] sm:$0xff] %v3515_v26  ;;  %v1874_v12 = vsel %vm96_vm5, %v1873_v41, %v1872_v29  ;;  %v2169_v31 = vrot.slane %v3511_v46, 2  ;;  %v2164_v19 = vsel %vm87_vm2, %v2163_v62, %v2162_v53  ;;  %v2171_v32 = vrot.slane %v3515_v26, 1 }
  0x5d   :  { %v1876_v56 = vsel %vm99_vm6, %v1875_v10, %v1874_v12  ;;  %v2166_v22 = vsel %vm90_vm3, %v2165_v61, %v2164_v19 }
  0x5e   :  { %v1878_v59 = vsel %vm102_vm7, %v1876_v56, -inf  ;;  %v2168_v58 = vsel %vm93_vm4, %v2167_v57, %v2166_v22 }
  0x5f   :  { %1879 = vmax.xlane.f32.xlu0 %v1878_v59  ;;  %v2170_v37 = vsel %vm96_vm5, %v2169_v31, %v2168_v58 }
  0x60   :  { %v2172_v41 = vsel %vm99_vm6, %v2171_v32, %v2170_v37 }
  0x61   :  { %v2174_v50 = vsel %vm102_vm7, %v2172_v41, -inf }
  0x62   :  { %2175 = vmax.xlane.f32.xlu1 %v2174_v50 }
  0xcf   :  { %v3536_v36 = vpop.xlane.xlu0 %104 }
  0xd0   :  { %4018 = vst [vmem:[#allocation31_spill] sm:$0xff] %v3536_v36  ;;  %v107_v10 = vrot.slane %v3536_v36, 1  ;;  %v122_v29 = vsub.f32 %v3280_v0, %v3536_v36  ;;  %v108_v56 = vrot.slane %v3536_v36, 2  ;;  %v109_v62 = vrot.slane %v3536_v36, 3 }
  0xd1   :  { %v110_v61 = vrot.slane %v3536_v36, 4  ;;  %v111_v58 = vrot.slane %v3536_v36, 5  ;;  %v112_v37 = vrot.slane %v3536_v36, 6  ;;  %v113_v57 = vrot.slane %v3536_v36, 7 }
  0xd2   :  { %v130_v12 = vmul.f32 1.442695, %v122_v29  ;;  %v123_v53 = vsub.f32 %v3282_v1, %v107_v10  ;;  %v124_v31 = vsub.f32 %v3284_v2, %v108_v56  ;;  %v125_v19 = vsub.f32 %v3286_v3, %v109_v62 }
  0xd3   :  { %v126_v0 = vsub.f32 %v3288_v4, %v110_v61  ;;  %v127_v32 = vsub.f32 %v3290_v5, %v111_v58  ;;  %v128_v59 = vsub.f32 %v3292_v6, %v112_v37  ;;  %v129_v22 = vsub.f32 %v3295_v8, %v113_v57 }
  0xd4   :  { %v132_v41 = vmul.f32 1.442695, %v123_v53  ;;  %v134_v50 = vmul.f32 1.442695, %v124_v31  ;;  %v136_v26 = vmul.f32 1.442695, %v125_v19  ;;  %2895 = vpow2.f32 %v130_v12 }
  0xd5   :  { %v3554_v36 = vpop.xlane.xlu1 %695  ;;  %v138_v29 = vmul.f32 1.442695, %v126_v0  ;;  %v140_v1 = vmul.f32 1.442695, %v127_v32  ;;  %v142_v10 = vmul.f32 1.442695, %v128_v59 }
  0xd6   :  { %v698_v2 = vrot.slane %v3554_v36, 1  ;;  %v713_v3 = vsub.f32 %v3307_v17, %v3554_v36  ;;  %2897 = vpow2.f32 %v132_v41  ;;  %v144_v4 = vmul.f32 1.442695, %v129_v22 }
  0xd7   :  { %2899 = vpow2.f32 %v134_v50  ;;  %v699_v5 = vrot.slane %v3554_v36, 2  ;;  %v700_v6 = vrot.slane %v3554_v36, 3  ;;  %v701_v8 = vrot.slane %v3554_v36, 4 }
  0xd8   :  { %v721_v56 = vmul.f32 1.442695, %v713_v3  ;;  %2901 = vpow2.f32 %v136_v26  ;;  %v702_v62 = vrot.slane %v3554_v36, 5  ;;  %v703_v61 = vrot.slane %v3554_v36, 6 }
  0xd9   :  { %v3564_v58 = vpop.xlane.xlu0 %399  ;;  %2903 = vpow2.f32 %v138_v29  ;;  %v704_v17 = vrot.slane %v3554_v36, 7  ;;  %v714_v37 = vsub.f32 %v3303_v14, %v698_v2  ;;  %v715_v57 = vsub.f32 %v3309_v18, %v699_v5 }
  0xda   :  { %2905 = vpow2.f32 %v721_v56  ;;  %v417_v12 = vsub.f32 %v3331_v34, %v3564_v58  ;;  %v716_v53 = vsub.f32 %v3313_v21, %v700_v6  ;;  %v717_v26 = vsub.f32 %v3316_v23, %v701_v8 }
  0xdb   :  { %2907 = vpow2.f32 %v140_v1  ;;  %v718_v31 = vsub.f32 %v3318_v24, %v702_v62  ;;  %v719_v19 = vsub.f32 %v3320_v25, %v703_v61  ;;  %v720_v32 = vsub.f32 %v3323_v27, %v704_v17 }
  0xdc   :  { %v425_v0 = vmul.f32 1.442695, %v417_v12  ;;  %2909 = vpow2.f32 %v142_v10  ;;  %v723_v14 = vmul.f32 1.442695, %v714_v37  ;;  %v402_v18 = vrot.slane %v3564_v58, 1 }
  0xdd   :  { %2911 = vpow2.f32 %v144_v4  ;;  %v725_v34 = vmul.f32 1.442695, %v715_v57  ;;  %v727_v22 = vmul.f32 1.442695, %v716_v53  ;;  %v729_v24 = vmul.f32 1.442695, %v717_v26 }
  0xde   :  { %v3577_v59 = vpop.xlane.xlu1 %991  ;;  %2913 = vpow2.f32 %v425_v0  ;;  %v2896_v25 = vpop.eup %2895  ;;  %v731_v41 = vmul.f32 1.442695, %v718_v31  ;;  %v733_v50 = vmul.f32 1.442695, %v719_v19  ;;  %v735_v27 = vmul.f32 1.442695, %v720_v32 }
  0xdf   :  { %v994_v21 = vrot.slane %v3577_v59, 1  ;;  %v1009_v23 = vsub.f32 %v3361_v54, %v3577_v59  ;;  %2915 = vpow2.f32 %v723_v14  ;;  %v403_v10 = vrot.slane %v3564_v58, 2 }
  0xe0   :  { %v2898_v29 = vpop.eup %2897  ;;  %2917 = vpow2.f32 %v725_v34  ;;  %v404_v2 = vrot.slane %v3564_v58, 3  ;;  %v405_v5 = vrot.slane %v3564_v58, 4  ;;  %v406_v54 = vrot.slane %v3564_v58, 5 }
  0xe1   :  { %v1017_v1 = vmul.f32 1.442695, %v1009_v23  ;;  %v2900_v3 = vpop.eup %2899  ;;  %v154_v4 = vrot.slane %v2898_v29, 7  ;;  %2919 = vpow2.f32 %v727_v22  ;;  %v407_v62 = vrot.slane %v3564_v58, 6 }
  0xe2   :  { %v2902_v6 = vpop.eup %2901  ;;  %v156_v56 = vrot.slane %v2900_v3, 6  ;;  %v408_v61 = vrot.slane %v3564_v58, 7  ;;  %v418_v53 = vsub.f32 %v3338_v39, %v402_v18  ;;  %v419_v22 = vsub.f32 %v3340_v40, %v403_v10 }
  0xe3   :  { %2921 = vpow2.f32 %v1017_v1  ;;  %v2904_v17 = vpop.eup %2903  ;;  %v155_v57 = vsel %vm81_vm0, %v154_v4, %v2896_v25  ;;  %v158_v12 = vrot.slane %v2902_v6, 5  ;;  %v420_v18 = vsub.f32 %v3344_v43, %v404_v2 }
  0xe4   :  { %v3586_v8 = vpop.xlane.xlu0 %1287  ;;  %v2906_v26 = vpop.eup %2905  ;;  %v157_v19 = vsel %vm84_vm1, %v156_v56, %v155_v57  ;;  %v160_v0 = vrot.slane %v2904_v17, 4  ;;  %2923 = vpow2.f32 %v729_v24  ;;  %v421_v3 = vsub.f32 %v3346_v44, %v405_v5 }
  0xe5   :  { %v1305_v37 = vsub.f32 %v3398_v33, %v3586_v8  ;;  %v1290_v31 = vrot.slane %v3586_v8, 1  ;;  %v2908_v32 = vpop.eup %2907  ;;  %v159_v34 = vsel %vm87_vm2, %v158_v12, %v157_v19  ;;  %2925 = vpow2.f32 %v731_v41 }
  0xe6   :  { %v2910_v33 = vpop.eup %2909  ;;  %v161_v25 = vsel %vm90_vm3, %v160_v0, %v159_v34  ;;  %v162_v39 = vrot.slane %v2908_v32, 3  ;;  %2927 = vpow2.f32 %v733_v50  ;;  %v422_v2 = vsub.f32 %v3350_v47, %v406_v54 }
  0xe7   :  { %v1313_v14 = vmul.f32 1.442695, %v1305_v37  ;;  %v2912_v29 = vpop.eup %2911  ;;  %v164_v1 = vrot.slane %v2910_v33, 2  ;;  %v423_v56 = vsub.f32 %v3352_v48, %v407_v62  ;;  %v427_v37 = vmul.f32 1.442695, %v418_v53 }
  0xe8   :  { %v3598_v23 = vpop.xlane.xlu1 %1583  ;;  %v3605_v41 = vpop.eup %2913  ;;  %v163_v10 = vsel %vm93_vm4, %v162_v39, %v161_v25  ;;  %v166_v4 = vrot.slane %v2912_v29, 1  ;;  %v429_v57 = vmul.f32 1.442695, %v419_v22  ;;  %v424_v0 = vsub.f32 %v3354_v49, %v408_v61 }
  0xe9   :  { %2929 = vpow2.f32 %v1313_v14  ;;  %v1601_v24 = vsub.f32 %v3426_v11, %v3598_v23  ;;  %v1586_v40 = vrot.slane %v3598_v23, 1  ;;  %v2916_v6 = vpop.eup %2915  ;;  %v165_v43 = vsel %vm96_vm5, %v164_v1, %v163_v10 }
  0xea   :  { %2931 = vpow2.f32 %v735_v27  ;;  %v2918_v11 = vpop.eup %2917  ;;  %v167_v44 = vsel %vm99_vm6, %v166_v4, %v165_v43  ;;  %v745_v5 = vrot.slane %v2916_v6, 7  ;;  %v431_v53 = vmul.f32 1.442695, %v420_v18 }
  0xeb   :  { %v1609_v50 = vmul.f32 1.442695, %v1601_v24  ;;  %v2920_v12 = vpop.eup %2919  ;;  %v169_v19 = vsel %vm102_vm7, %v167_v44, 0.0  ;;  %v747_v54 = vrot.slane %v2918_v11, 6  ;;  %v433_v14 = vmul.f32 1.442695, %v421_v3 }
  0xec   :  { %v3612_v17 = vpop.xlane.xlu0 %1879  ;;  %170 = vadd.xlane.f32.xlu0 %v169_v19  ;;  %v746_v48 = vsel %vm81_vm0, %v745_v5, %v2906_v26  ;;  %v749_v62 = vrot.slane %v2920_v12, 5  ;;  %v435_v49 = vmul.f32 1.442695, %v422_v2  ;;  %v437_v61 = vmul.f32 1.442695, %v423_v56 }
  0xed   :  { %2933 = vpow2.f32 %v1609_v50  ;;  %v1897_v27 = vsub.f32 %v3457_v20, %v3612_v17  ;;  %v3619_v47 = vpop.eup %2921  ;;  %v1882_v22 = vrot.slane %v3612_v17, 1  ;;  %v748_v33 = vsel %vm84_vm1, %v747_v54, %v746_v48 }
  0xee   :  { %2935 = vpow2.f32 %v427_v37  ;;  %v2924_v34 = vpop.eup %2923  ;;  %v750_v39 = vsel %vm87_vm2, %v749_v62, %v748_v33  ;;  %v439_v29 = vmul.f32 1.442695, %v424_v0  ;;  %v995_v6 = vrot.slane %v3577_v59, 2 }
  0xef   :  { %v1905_v32 = vmul.f32 1.442695, %v1897_v27  ;;  %2937 = vpow2.f32 %v429_v57  ;;  %v3623_v20 = vpop.xlane.xlu1 %2175  ;;  %v2926_v25 = vpop.eup %2925  ;;  %v751_v1 = vrot.slane %v2924_v34, 4  ;;  %v996_v50 = vrot.slane %v3577_v59, 3 }
  0xf0   :  { %v2193_v26 = vsub.f32 %v3488_v52, %v3623_v20  ;;  %v2928_v24 = vpop.eup %2927  ;;  %v2178_v18 = vrot.slane %v3623_v20, 1  ;;  %v753_v3 = vrot.slane %v2926_v25, 3  ;;  %v997_v2 = vrot.slane %v3577_v59, 4 }
  0xf1   :  { %2939 = vpow2.f32 %v1905_v32  ;;  %v755_v4 = vrot.slane %v2928_v24, 2  ;;  %v752_v52 = vsel %vm90_vm3, %v751_v1, %v750_v39  ;;  %v998_v56 = vrot.slane %v3577_v59, 5 }
  0xf2   :  { %2941 = vpow2.f32 %v431_v53  ;;  %v3637_v11 = vmul.f32 1.442695, %v2193_v26  ;;  %v754_v44 = vsel %vm93_vm4, %v753_v3, %v752_v52  ;;  %v999_v37 = vrot.slane %v3577_v59, 6 }
  0xf3   :  { %v3630_v10 = vpop.eup %2929  ;;  %2943 = vpow2.f32 %v433_v14  ;;  %v756_v57 = vsel %vm96_vm5, %v755_v4, %v754_v44  ;;  %v1000_v12 = vrot.slane %v3577_v59, 7  ;;  %v1010_v27 = vsub.f32 %v3363_v55, %v994_v21 }
  0xf4   :  { %v2932_v43 = vpop.eup %2931  ;;  %2945 = vpow2.f32 %v435_v49  ;;  %v1011_v48 = vsub.f32 %v3369_v60, %v995_v6  ;;  %v1012_v54 = vsub.f32 %v3374_v7, %v996_v50  ;;  %v1013_v53 = vsub.f32 %v3376_v9, %v997_v2 }
  0xf5   :  { %v757_v5 = vrot.slane %v2932_v43, 1  ;;  %2947 = vpow2.f32 %v437_v61  ;;  %v1014_v14 = vsub.f32 %v3381_v13, %v998_v56  ;;  %v1015_v34 = vsub.f32 %v3383_v15, %v999_v37 }
  0xf6   :  { %2949 = vpow2.f32 %v439_v29  ;;  %v1016_v21 = vsub.f32 %v3385_v16, %v1000_v12  ;;  %v1019_v49 = vmul.f32 1.442695, %v1010_v27  ;;  %v1021_v61 = vmul.f32 1.442695, %v1011_v48 }
  0xf7   :  { %v3646_v19 = vpop.eup %2933  ;;  %v758_v0 = vsel %vm99_vm6, %v757_v5, %v756_v57  ;;  %v1023_v60 = vmul.f32 1.442695, %v1012_v54  ;;  %v1025_v26 = vmul.f32 1.442695, %v1013_v53  ;;  %v1291_v7 = vrot.slane %v3586_v8, 2 }
  0xf8   :  { %v2936_v62 = vpop.eup %2935  ;;  %v760_v32 = vsel %vm102_vm7, %v758_v0, 0.0  ;;  %2951 = vpow2.f32 %v1019_v49  ;;  %v1027_v13 = vmul.f32 1.442695, %v1014_v14  ;;  %v1029_v15 = vmul.f32 1.442695, %v1015_v34  ;;  %v4019_v14 = vld [vmem:[#allocation12_spill] sm:$0xff] }
  0xf9   :  { %v2938_v33 = vpop.eup %2937  ;;  %761 = vadd.xlane.f32.xlu0 %v760_v32  ;;  %v449_v55 = vrot.slane %v2936_v62, 7  ;;  %2953 = vpow2.f32 %v1021_v61  ;;  %v1031_v16 = vmul.f32 1.442695, %v1016_v21  ;;  %v1292_v1 = vrot.slane %v3586_v8, 3 }
  0xfa   :  { %v451_v25 = vrot.slane %v2938_v33, 6  ;;  %2955 = vpow2.f32 %v1023_v60  ;;  %v1293_v6 = vrot.slane %v3586_v8, 4  ;;  %v1294_v50 = vrot.slane %v3586_v8, 5 }
  0xfb   :  { %v3657_v39 = vpop.eup %2939  ;;  %v450_v9 = vsel %vm81_vm0, %v449_v55, %v3605_v41  ;;  %2957 = vpow2.f32 %v1025_v26  ;;  %v1295_v41 = vrot.slane %v3586_v8, 6  ;;  %v1296_v2 = vrot.slane %v3586_v8, 7 }
  0xfc   :  { %v2942_v29 = vpop.eup %2941  ;;  %v452_v24 = vsel %vm84_vm1, %v451_v25, %v450_v9  ;;  %2959 = vpow2.f32 %v1027_v13  ;;  %v1306_v5 = vsub.f32 %v3392_v28, %v1290_v31  ;;  %v1307_v12 = vsub.f32 %v3400_v35, %v1291_v7  ;;  %v4020_v31 = vld [vmem:[#allocation13_spill] sm:$0xff] }
  0xfd   :  { %v2944_v3 = vpop.eup %2943  ;;  %v453_v4 = vrot.slane %v2942_v29, 5  ;;  %2961 = vpow2.f32 %v1029_v15  ;;  %v1308_v27 = vsub.f32 %v3406_v42, %v1292_v1  ;;  %v1309_v62 = vsub.f32 %v3408_v45, %v1293_v6 }
  0xfe   :  { %v2946_v43 = vpop.eup %2945  ;;  %v455_v52 = vrot.slane %v2944_v3, 4  ;;  %2963 = vpow2.f32 %v1031_v16  ;;  %v1310_v53 = vsub.f32 %v3412_v51, %v1294_v50  ;;  %v1311_v28 = vsub.f32 %v4019_v14, %v1295_v41 }
  0xff   :  { %v454_v56 = vsel %vm87_vm2, %v453_v4, %v452_v24  ;;  %v457_v44 = vrot.slane %v2946_v43, 3  ;;  %v2948_v37 = vpop.eup %2947  ;;  %v1312_v34 = vsub.f32 %v4020_v31, %v1296_v2  ;;  %v1315_v55 = vmul.f32 1.442695, %v1306_v5  ;;  %v4021_v2 = vld [vmem:[#allocation14_spill] sm:$0xff] }
 0x100   :  { %v456_v57 = vsel %vm90_vm3, %v455_v52, %v454_v56  ;;  %v2950_v0 = vpop.eup %2949  ;;  %v459_v54 = vrot.slane %v2948_v37, 2  ;;  %v1317_v35 = vmul.f32 1.442695, %v1307_v12  ;;  %v1319_v21 = vmul.f32 1.442695, %v1308_v27 }
 0x101   :  { %v458_v48 = vsel %vm93_vm4, %v457_v44, %v456_v57  ;;  %v461_v32 = vrot.slane %v2950_v0, 1  ;;  %v1321_v49 = vmul.f32 1.442695, %v1309_v62  ;;  %v1323_v61 = vmul.f32 1.442695, %v1310_v53  ;;  %v4022_v57 = vld [vmem:[#allocation15_spill] sm:$0xff] }
 0x102   :  { %v460_v33 = vsel %vm96_vm5, %v459_v54, %v458_v48  ;;  %v1325_v25 = vmul.f32 1.442695, %v1311_v28  ;;  %v2952_v60 = vpop.eup %2951  ;;  %2965 = vpow2.f32 %v1315_v55  ;;  %v1327_v26 = vmul.f32 1.442695, %v1312_v34  ;;  %v4023_v48 = vld [vmem:[#allocation16_spill] sm:$0xff]  ;;  %v4024_v53 = vld [vmem:[#allocation17_spill] sm:$0xff] }
 0x103   :  { %v462_v42 = vsel %vm99_vm6, %v461_v32, %v460_v33  ;;  %v1587_v51 = vrot.slane %v3598_v23, 2  ;;  %v2954_v7 = vpop.eup %2953  ;;  %v1041_v9 = vrot.slane %v2952_v60, 7  ;;  %2967 = vpow2.f32 %v1317_v35  ;;  %v4026_v34 = vld [vmem:[#allocation19_spill] sm:$0xff]  ;;  %v4027_v55 = vld [vmem:[#allocation20_spill] sm:$0xff] }
 0x104   :  { %v464_v45 = vsel %vm102_vm7, %v462_v42, 0.0  ;;  %v1588_v13 = vrot.slane %v3598_v23, 3  ;;  %v1589_v15 = vrot.slane %v3598_v23, 4  ;;  %v2956_v29 = vpop.eup %2955  ;;  %v1043_v24 = vrot.slane %v2954_v7, 6 }
 0x105   :  { %465 = vadd.xlane.f32.xlu1 %v464_v45  ;;  %2969 = vpow2.f32 %v1319_v21  ;;  %v1590_v16 = vrot.slane %v3598_v23, 5  ;;  %v1591_v1 = vrot.slane %v3598_v23, 6  ;;  %v2958_v3 = vpop.eup %2957  ;;  %v1042_v4 = vsel %vm81_vm0, %v1041_v9, %v3619_v47 }
 0x106   :  { %v1045_v6 = vrot.slane %v2956_v29, 5  ;;  %2971 = vpow2.f32 %v1321_v49  ;;  %v1592_v50 = vrot.slane %v3598_v23, 7  ;;  %v2960_v43 = vpop.eup %2959  ;;  %v1044_v52 = vsel %vm84_vm1, %v1043_v24, %v1042_v4 }
 0x107   :  { %v1047_v41 = vrot.slane %v2958_v3, 4  ;;  %2973 = vpow2.f32 %v1323_v61  ;;  %v1602_v56 = vsub.f32 %v4021_v2, %v1586_v40  ;;  %v2962_v44 = vpop.eup %2961  ;;  %v1049_v37 = vrot.slane %v2960_v43, 3  ;;  %v4025_v40 = vld [vmem:[#allocation18_spill] sm:$0xff] }
 0x108   :  { %v1046_v5 = vsel %vm87_vm2, %v1045_v6, %v1044_v52  ;;  %2975 = vpow2.f32 %v1325_v25  ;;  %v1603_v47 = vsub.f32 %v4022_v57, %v1587_v51  ;;  %v2964_v12 = vpop.eup %2963  ;;  %v1051_v0 = vrot.slane %v2962_v44, 2 }
 0x109   :  { %v1048_v27 = vsel %vm90_vm3, %v1047_v41, %v1046_v5  ;;  %2977 = vpow2.f32 %v1327_v26  ;;  %v1604_v54 = vsub.f32 %v4023_v48, %v1588_v13  ;;  %v1053_v32 = vrot.slane %v2964_v12, 1  ;;  %v4028_v12 = vld [vmem:[#allocation21_spill] sm:$0xff] }
 0x10a   :  { %v1050_v62 = vsel %vm93_vm4, %v1049_v37, %v1048_v27  ;;  %v1605_v14 = vsub.f32 %v4024_v53, %v1589_v15  ;;  %v1606_v28 = vsub.f32 %v4025_v40, %v1590_v16  ;;  %v1607_v33 = vsub.f32 %v4026_v34, %v1591_v1  ;;  %v4031_v40 = vld [vmem:[#allocation24_spill] sm:$0xff] }
 0x10b   :  { %v1052_v31 = vsel %vm96_vm5, %v1051_v0, %v1050_v62  ;;  %v1608_v35 = vsub.f32 %v4027_v55, %v1592_v50  ;;  %v1611_v21 = vmul.f32 1.442695, %v1602_v56  ;;  %v1613_v49 = vmul.f32 1.442695, %v1603_v47 }
 0x10c   :  { %v1054_v42 = vsel %vm99_vm6, %v1053_v32, %v1052_v31  ;;  %v1615_v61 = vmul.f32 1.442695, %v1604_v54  ;;  %v1617_v25 = vmul.f32 1.442695, %v1605_v14  ;;  %v2966_v60 = vpop.eup %2965  ;;  %v1619_v26 = vmul.f32 1.442695, %v1606_v28 }
 0x10d   :  { %v1056_v45 = vsel %vm102_vm7, %v1054_v42, 0.0  ;;  %2979 = vpow2.f32 %v1611_v21  ;;  %v1621_v51 = vmul.f32 1.442695, %v1607_v33  ;;  %v2968_v7 = vpop.eup %2967  ;;  %v1337_v9 = vrot.slane %v2966_v60, 7  ;;  %v4029_v54 = vld [vmem:[#allocation22_spill] sm:$0xff]  ;;  %v4030_v32 = vld [vmem:[#allocation23_spill] sm:$0xff] }
 0x10e   :  { %1057 = vadd.xlane.f32.xlu1 %v1056_v45  ;;  %2981 = vpow2.f32 %v1613_v49  ;;  %v1623_v13 = vmul.f32 1.442695, %v1608_v35  ;;  %v1883_v15 = vrot.slane %v3612_v17, 2  ;;  %v1339_v24 = vrot.slane %v2968_v7, 6  ;;  %v4032_v31 = vld [vmem:[#allocation25_spill] sm:$0xff]  ;;  %v4033_v35 = vld [vmem:[#allocation26_spill] sm:$0xff] }
 0x10f   :  { %v2970_v29 = vpop.eup %2969  ;;  %2983 = vpow2.f32 %v1615_v61  ;;  %v1884_v16 = vrot.slane %v3612_v17, 3  ;;  %v1885_v1 = vrot.slane %v3612_v17, 4  ;;  %v1338_v4 = vsel %vm81_vm0, %v1337_v9, %v3630_v10 }
 0x110   :  { %v2972_v3 = vpop.eup %2971  ;;  %v1341_v6 = vrot.slane %v2970_v29, 5  ;;  %2985 = vpow2.f32 %v1617_v25  ;;  %v1886_v50 = vrot.slane %v3612_v17, 5  ;;  %v1340_v52 = vsel %vm84_vm1, %v1339_v24, %v1338_v4 }
 0x111   :  { %v2974_v43 = vpop.eup %2973  ;;  %v1343_v41 = vrot.slane %v2972_v3, 4  ;;  %2987 = vpow2.f32 %v1619_v26  ;;  %v1887_v2 = vrot.slane %v3612_v17, 6  ;;  %v1888_v37 = vrot.slane %v3612_v17, 7 }
 0x112   :  { %v2976_v56 = vpop.eup %2975  ;;  %v1342_v44 = vsel %vm87_vm2, %v1341_v6, %v1340_v52  ;;  %v1345_v5 = vrot.slane %v2974_v43, 3  ;;  %2989 = vpow2.f32 %v1621_v51  ;;  %v1898_v27 = vsub.f32 %v4028_v12, %v1882_v22 }
 0x113   :  { %v2978_v57 = vpop.eup %2977  ;;  %v1344_v10 = vsel %vm90_vm3, %v1343_v41, %v1342_v44  ;;  %v1347_v47 = vrot.slane %v2976_v56, 2  ;;  %2991 = vpow2.f32 %v1623_v13  ;;  %v1899_v62 = vsub.f32 %v4029_v54, %v1883_v15  ;;  %v4035_v54 = vld [vmem:[#allocation28_spill] sm:$0xff] }
 0x114   :  { %v1346_v0 = vsel %vm93_vm4, %v1345_v5, %v1344_v10  ;;  %v1349_v48 = vrot.slane %v2978_v57, 1  ;;  %v1900_v53 = vsub.f32 %v4030_v32, %v1884_v16  ;;  %v1901_v28 = vsub.f32 %v4031_v40, %v1885_v1 }
 0x115   :  { %v1348_v14 = vsel %vm96_vm5, %v1347_v47, %v1346_v0  ;;  %v1902_v34 = vsub.f32 %v4032_v31, %v1886_v50  ;;  %v1903_v33 = vsub.f32 %v3478_v38, %v1887_v2  ;;  %v1904_v21 = vsub.f32 %v4033_v35, %v1888_v37  ;;  %v4034_v47 = vld [vmem:[#allocation27_spill] sm:$0xff]  ;;  %v4037_v31 = vld [vmem:[#allocation30_spill] sm:$0xff] }
 0x116   :  { %v1350_v55 = vsel %vm99_vm6, %v1349_v48, %v1348_v14  ;;  %v1907_v22 = vmul.f32 1.442695, %v1898_v27  ;;  %v1909_v42 = vmul.f32 1.442695, %v1899_v62  ;;  %v1911_v25 = vmul.f32 1.442695, %v1900_v53 }
 0x117   :  { %v2980_v49 = vpop.eup %2979  ;;  %v1352_v61 = vsel %vm102_vm7, %v1350_v55, 0.0  ;;  %v1913_v60 = vmul.f32 1.442695, %v1901_v28  ;;  %v2179_v45 = vrot.slane %v3623_v20, 2  ;;  %v1915_v7 = vmul.f32 1.442695, %v1902_v34 }
 0x118   :  { %v2982_v26 = vpop.eup %2981  ;;  %1353 = vadd.xlane.f32.xlu0 %v1352_v61  ;;  %v1633_v51 = vrot.slane %v2980_v49, 7  ;;  %2993 = vpow2.f32 %v1907_v22  ;;  %v1917_v9 = vmul.f32 1.442695, %v1903_v33  ;;  %v1919_v15 = vmul.f32 1.442695, %v1904_v21  ;;  %v4036_v53 = vld [vmem:[#allocation29_spill] sm:$0xff] }
 0x119   :  { %v2984_v38 = vpop.eup %2983  ;;  %v1635_v13 = vrot.slane %v2982_v26, 6  ;;  %2995 = vpow2.f32 %v1909_v42  ;;  %v2180_v29 = vrot.slane %v3623_v20, 3  ;;  %v2181_v3 = vrot.slane %v3623_v20, 4 }
 0x11a   :  { %v2986_v24 = vpop.eup %2985  ;;  %v1634_v16 = vsel %vm81_vm0, %v1633_v51, %v3646_v19  ;;  %v1637_v1 = vrot.slane %v2984_v38, 5  ;;  %2997 = vpow2.f32 %v1911_v25  ;;  %v2182_v43 = vrot.slane %v3623_v20, 5 }
 0x11b   :  { %v2988_v4 = vpop.eup %2987  ;;  %v1636_v6 = vsel %vm84_vm1, %v1635_v13, %v1634_v16  ;;  %v1639_v50 = vrot.slane %v2986_v24, 4  ;;  %2999 = vpow2.f32 %v1913_v60  ;;  %v2183_v56 = vrot.slane %v3623_v20, 6 }
 0x11c   :  { %v2990_v52 = vpop.eup %2989  ;;  %v1638_v41 = vsel %vm87_vm2, %v1637_v1, %v1636_v6  ;;  %v1641_v2 = vrot.slane %v2988_v4, 3  ;;  %3001 = vpow2.f32 %v1915_v7  ;;  %v2184_v37 = vrot.slane %v3623_v20, 7 }
 0x11d   :  { %v2992_v44 = vpop.eup %2991  ;;  %v1640_v19 = vsel %vm90_vm3, %v1639_v50, %v1638_v41  ;;  %v1643_v5 = vrot.slane %v2990_v52, 2  ;;  %3003 = vpow2.f32 %v1917_v9  ;;  %v2194_v12 = vsub.f32 %v4034_v47, %v2178_v18 }
 0x11e   :  { %v1642_v57 = vsel %vm93_vm4, %v1641_v2, %v1640_v19  ;;  %v1645_v10 = vrot.slane %v2992_v44, 1  ;;  %3005 = vpow2.f32 %v1919_v15  ;;  %v2195_v0 = vsub.f32 %v3496_v63, %v2179_v45 }
 0x11f   :  { %v1644_v27 = vsel %vm96_vm5, %v1643_v5, %v1642_v57  ;;  %v2196_v48 = vsub.f32 %v3501_v30, %v2180_v29  ;;  %v2197_v62 = vsub.f32 %v4035_v54, %v2181_v3  ;;  %v2198_v14 = vsub.f32 %v4036_v53, %v2182_v43 }
 0x120   :  { %v1646_v32 = vsel %vm99_vm6, %v1645_v10, %v1644_v27  ;;  %v2199_v40 = vsub.f32 %v3511_v46, %v2183_v56  ;;  %v2200_v34 = vsub.f32 %v4037_v31, %v2184_v37  ;;  %v2203_v33 = vmul.f32 1.442695, %v2194_v12  ;;  %v2617_v31 = vld [vmem:[#allocation6 + $0x10] sm:$0xff]  }
 0x121   :  { %v1648_v28 = vsel %vm102_vm7, %v1646_v32, 0.0  ;;  %v2205_v18 = vmul.f32 1.442695, %v2195_v0  ;;  %3007 = vpow2.f32 %v3637_v11  ;;  %v2207_v63 = vmul.f32 1.442695, %v2196_v48 }
 0x122   :  { %v2994_v55 = vpop.eup %2993  ;;  %1649 = vadd.xlane.f32.xlu1 %v1648_v28  ;;  %v2209_v30 = vmul.f32 1.442695, %v2197_v62  ;;  %3009 = vpow2.f32 %v2203_v33  ;;  %v2211_v22 = vmul.f32 1.442695, %v2198_v14  ;;  %v2213_v46 = vmul.f32 1.442695, %v2199_v40 }
 0x123   :  { %v2996_v35 = vpop.eup %2995  ;;  %v1929_v21 = vrot.slane %v2994_v55, 7  ;;  %3011 = vpow2.f32 %v2205_v18  ;;  %v2215_v45 = vmul.f32 1.442695, %v2200_v34  ;;  %v3210_v14 = vmov 0.0|0.0   ;;  %v2609_v40 = vld [vmem:[#allocation6] sm:$0xff]   ;;  %v2672_v28 = vld [vmem:[#allocation6 + $0x8] sm:$0xff]  }
 0x124   :  { %v2998_v42 = vpop.eup %2997  ;;  %v1931_v49 = vrot.slane %v2996_v35, 6  ;;  %3013 = vpow2.f32 %v2207_v63  ;;  %2808 = vmatprep.subr.bf16.mxu0 %v3210_v14  ;;  %2814 = vmatprep.subr.bf16.mxu1 %v3210_v14  ;;  %v3212_v34 = vmov 0.0   ;;  %v2673_v33 = vld [vmem:[#allocation6 + $0x18] sm:$0xff]  }
 0x125   :  { %v3000_v61 = vpop.eup %2999  ;;  %v1930_v25 = vsel %vm81_vm0, %v1929_v21, %v3657_v39  ;;  %v1933_v60 = vrot.slane %v2998_v42, 5  ;;  %3015 = vpow2.f32 %v2209_v30  ;;  %2810 = vmatpush3.bf16.msra.mxu0 %v2609_v40  ;;  %2816 = vmatpush3.bf16.msra.mxu1 %v2617_v31  ;;  %v4038_v35 = vld [vmem:[#allocation31_spill] sm:$0xff] }
 0x126   :  { %v3002_v26 = vpop.eup %3001  ;;  %v1932_v11 = vsel %vm84_vm1, %v1931_v49, %v1930_v25  ;;  %v1935_v51 = vrot.slane %v3000_v61, 4  ;;  %3017 = vpow2.f32 %v2211_v22  ;;  %2811 = vmatprep.subr.bf16.mxu0 %v3210_v14  ;;  %2817 = vmatprep.subr.bf16.mxu1 %v3210_v14 }
 0x127   :  { %v3004_v7 = vpop.eup %3003  ;;  %v1934_v9 = vsel %vm87_vm2, %v1933_v60, %v1932_v11  ;;  %v1937_v38 = vrot.slane %v3002_v26, 3  ;;  %3019 = vpow2.f32 %v2213_v46  ;;  %2728 = vmatprep.mubr.msk.f32.mxu0 %vm3211_vm8, %v3212_v34  ;;  %2739 = vmatprep.mubr.msk.f32.mxu1 %vm3211_vm8, %v3212_v34  ;;  %v3040_v11 = vld [vmem:[#allocation3 + $0x10] sm:$0x1] }
 0x128   :  { %v3006_v13 = vpop.eup %3005  ;;  %v1936_v15 = vsel %vm90_vm3, %v1935_v51, %v1934_v9  ;;  %v1939_v29 = vrot.slane %v3004_v7, 2  ;;  %3021 = vpow2.f32 %v2215_v45  ;;  %v3039_v45 = vld [vmem:[#allocation3 + $0x8] sm:$0x1]  ;;  %v3041_v7 = vld [vmem:[#allocation3 + $0x18] sm:$0x1] }
 0x129   :  { %v1938_v39 = vsel %vm93_vm4, %v1937_v38, %v1936_v15  ;;  %v1941_v24 = vrot.slane %v3006_v13, 1  ;;  %2813 = vmatpush3.bf16.msra.mxu0 %v2672_v28  ;;  %2819 = vmatpush3.bf16.msra.mxu1 %v2673_v33  ;;  %v3042_v38 = vld [vmem:[#allocation3 + $0x20] sm:$0x1]  ;;  %v3047_v33 = vld [vmem:[#allocation3 + $0xa] sm:$0x1] }
 0x12a   :  { %v1940_v16 = vsel %vm96_vm5, %v1939_v29, %v1938_v39  ;;  %2820 = vmatprep.subr.bf16.mxu0 %v3210_v14  ;;  %2826 = vmatprep.subr.bf16.mxu1 %v3210_v14  ;;  %v3043_v15 = vld [vmem:[#allocation3] sm:$0x1]  ;;  %v3044_v39 = vld [vmem:[#allocation3 + $0x28] sm:$0x1] }
 0x12b   :  { %v1942_v1 = vsel %vm99_vm6, %v1941_v24, %v1940_v16  ;;  %v3008_v3 = vpop.eup %3007 }
 0x12c   :  { %v1944_v4 = vsel %vm102_vm7, %v1942_v1, 0.0  ;;  %v3010_v6 = vpop.eup %3009 }
 0x12d   :  { %1945 = vadd.xlane.f32.xlu0 %v1944_v4  ;;  %v3012_v50 = vpop.eup %3011  ;;  %v2225_v43 = vrot.slane %v3010_v6, 7 }
 0x12e   :  { %v3014_v52 = vpop.eup %3013  ;;  %v2227_v41 = vrot.slane %v3012_v50, 6  ;;  %v3046_v50 = vld [vmem:[#allocation3 + $0x38] sm:$0x1] }
 0x12f   :  { %v3016_v2 = vpop.eup %3015  ;;  %v2226_v56 = vsel %vm81_vm0, %v2225_v43, %v3008_v3  ;;  %v2229_v44 = vrot.slane %v3014_v52, 5  ;;  %v3045_v3 = vld [vmem:[#allocation3 + $0x30] sm:$0x1] }
 0x130   :  { %v3018_v19 = vpop.eup %3017  ;;  %v2228_v5 = vsel %vm84_vm1, %v2227_v41, %v2226_v56  ;;  %v2231_v37 = vrot.slane %v3016_v2, 4 }
 0x131   :  { %v3020_v57 = vpop.eup %3019  ;;  %v2230_v10 = vsel %vm87_vm2, %v2229_v44, %v2228_v5  ;;  %v2233_v47 = vrot.slane %v3018_v19, 3 }
 0x132   :  { %v3022_v12 = vpop.eup %3021  ;;  %v2232_v27 = vsel %vm90_vm3, %v2231_v37, %v2230_v10  ;;  %v2235_v0 = vrot.slane %v3020_v57, 2 }
 0x133   :  { %v2234_v48 = vsel %vm93_vm4, %v2233_v47, %v2232_v27  ;;  %v2237_v54 = vrot.slane %v3022_v12, 1 }
 0x134   :  { %v2236_v62 = vsel %vm96_vm5, %v2235_v0, %v2234_v48  ;;  %v2625_v48 = vld [vmem:[#allocation6 + $0x20] sm:$0xff]  }
 0x135   :  { %v2238_v32 = vsel %vm99_vm6, %v2237_v54, %v2236_v62 }
 0x136   :  { %v2240_v53 = vsel %vm102_vm7, %v2238_v32, 0.0 }
 0x137   :  { %2241 = vadd.xlane.f32.xlu1 %v2240_v53 }
 0x179   :  { %v171_v18 = vpop.xlane.xlu0 %170 }
 0x17a   :  { %3023 = vlog2.f32 %v171_v18 }
 0x184   :  { %v3024_v55 = vpop.eup %3023 }
 0x185   :  { %v173_v30 = vmul.f32 0.6931472, %v3024_v55  ;;  %v3048_v55 = vld [vmem:[#allocation3 + $0x12] sm:$0x1] }
 0x186   :  { %v762_v63 = vpop.xlane.xlu0 %761 }
 0x187   :  { %3025 = vlog2.f32 %v762_v63  ;;  %v174_v21 = vadd.f32 %v173_v30, %v4038_v35  ;;  %v3049_v30 = vld [vmem:[#allocation3 + $0x1a] sm:$0x1] }
 0x189   :  { %v176_v22 = vrot.slane %v174_v21, 1  ;;  %v177_v42 = vrot.slane %v174_v21, 2  ;;  %v178_v49 = vrot.slane %v174_v21, 3  ;;  %v179_v46 = vrot.slane %v174_v21, 4 }
 0x18a   :  { %v180_v61 = vrot.slane %v174_v21, 5  ;;  %v181_v25 = vrot.slane %v174_v21, 6  ;;  %v182_v60 = vrot.slane %v174_v21, 7  ;;  %v191_v29 = vsub.f32 %v3043_v15, %v174_v21  ;;  %v3050_v21 = vld [vmem:[#allocation3 + $0x22] sm:$0x1] }
 0x18b   :  { %v192_v26 = vsub.f32 %v3039_v45, %v176_v22  ;;  %v193_v51 = vsub.f32 %v3040_v11, %v177_v42  ;;  %v194_v9 = vsub.f32 %v3041_v7, %v178_v49  ;;  %v195_v13 = vsub.f32 %v3042_v38, %v179_v46  ;;  %v2674_v42 = vld [vmem:[#allocation6 + $0x28] sm:$0xff]   ;;  %v3051_v49 = vld [vmem:[#allocation3 + $0x2] sm:$0x1] }
 0x18c   :  { %v196_v24 = vsub.f32 %v3044_v39, %v180_v61  ;;  %v197_v4 = vsub.f32 %v3045_v3, %v181_v25  ;;  %v198_v43 = vsub.f32 %v3046_v50, %v182_v60  ;;  %v3052_v61 = vld [vmem:[#allocation3 + $0x2a] sm:$0x1] }
 0x18d   :  { %v215_v16 = vrot.slane %v192_v26, 7  ;;  %v217_v1 = vrot.slane %v193_v51, 6  ;;  %v219_v41 = vrot.slane %v194_v9, 5  ;;  %v221_v44 = vrot.slane %v195_v13, 4  ;;  %v3053_v26 = vld [vmem:[#allocation3 + $0x32] sm:$0x1] }
 0x18e   :  { %v223_v37 = vrot.slane %v196_v24, 3  ;;  %v225_v47 = vrot.slane %v197_v4, 2  ;;  %v227_v27 = vrot.slane %v198_v43, 1  ;;  %v3054_v51 = vld [vmem:[#allocation3 + $0x3a] sm:$0x1] }
 0x18f   :  { %v216_v52 = vsel %vm81_vm0, %v215_v16, %v191_v29 }
 0x190   :  { %v218_v56 = vsel %vm84_vm1, %v217_v1, %v216_v52 }
 0x191   :  { %v3026_v6 = vpop.eup %3025  ;;  %v220_v5 = vsel %vm87_vm2, %v219_v41, %v218_v56  ;;  %v2641_v41 = vld [vmem:[#allocation6 + $0x40] sm:$0xff]  }
 0x192   :  { %v764_v2 = vmul.f32 0.6931472, %v3026_v6  ;;  %v466_v19 = vpop.xlane.xlu1 %465  ;;  %v222_v10 = vsel %vm90_vm3, %v221_v44, %v220_v5 }
 0x193   :  { %3027 = vlog2.f32 %v466_v19  ;;  %v224_v12 = vsel %vm93_vm4, %v223_v37, %v222_v10 }
 0x194   :  { %v765_v57 = vadd.f32 %v764_v2, %v3554_v36  ;;  %v226_v0 = vsel %vm96_vm5, %v225_v47, %v224_v12  ;;  %v3055_v47 = vld [vmem:[#allocation3 + $0x9] sm:$0x1]  ;;  %v3056_v12 = vld [vmem:[#allocation3 + $0x11] sm:$0x1] }
 0x195   :  { %v228_v53 = vsel %vm99_vm6, %v227_v27, %v226_v0  ;;  %v3057_v0 = vld [vmem:[#allocation3 + $0x19] sm:$0x1] }
 0x196   :  { %v767_v54 = vrot.slane %v765_v57, 1  ;;  %v768_v62 = vrot.slane %v765_v57, 2  ;;  %v769_v32 = vrot.slane %v765_v57, 3  ;;  %v770_v40 = vrot.slane %v765_v57, 4  ;;  %2729 = vmatmul.mubr.msk.f32.vlgmr.msra.gmra.mrb[0].mxu0 %vm102_vm7, %v228_v53 }
 0x197   :  { %v771_v28 = vrot.slane %v765_v57, 5  ;;  %v772_v31 = vrot.slane %v765_v57, 6  ;;  %v773_v36 = vrot.slane %v765_v57, 7  ;;  %2822 = vmatpush3.bf16.msra.mxu0 %v2625_v48  ;;  %2750 = vmatprep.mubr.msk.f32.mxu0 %vm3211_vm8, %v3212_v34  ;;  %v782_v46 = vsub.f32 %v3051_v49, %v765_v57 }
 0x198   :  { %v783_v18 = vsub.f32 %v3047_v33, %v767_v54  ;;  %v784_v63 = vsub.f32 %v3048_v55, %v768_v62  ;;  %v785_v35 = vsub.f32 %v3049_v30, %v769_v32  ;;  %v786_v22 = vsub.f32 %v3050_v21, %v770_v40  ;;  %2823 = vmatprep.subr.bf16.mxu0 %v3210_v14  ;;  %v2676_v54 = vld [vmem:[#allocation6 + $0x48] sm:$0xff]   ;;  %v3058_v62 = vld [vmem:[#allocation3 + $0x21] sm:$0x1] }
 0x199   :  { %v787_v25 = vsub.f32 %v3052_v61, %v771_v28  ;;  %v788_v11 = vsub.f32 %v3053_v26, %v772_v31  ;;  %v789_v7 = vsub.f32 %v3054_v51, %v773_v36  ;;  %v3059_v40 = vld [vmem:[#allocation3 + $0x1] sm:$0x1]  ;;  %v3060_v31 = vld [vmem:[#allocation3 + $0x29] sm:$0x1] }
 0x19a   :  { %v807_v60 = vrot.slane %v783_v18, 7  ;;  %v809_v45 = vrot.slane %v784_v63, 6  ;;  %v811_v38 = vrot.slane %v785_v35, 5  ;;  %v813_v29 = vrot.slane %v786_v22, 4  ;;  %v3061_v63 = vld [vmem:[#allocation3 + $0x31] sm:$0x1] }
 0x19b   :  { %v1058_v13 = vpop.xlane.xlu1 %1057  ;;  %2825 = vmatpush3.bf16.msra.mxu0 %v2674_v42  ;;  %v815_v16 = vrot.slane %v787_v25, 3  ;;  %v817_v4 = vrot.slane %v788_v11, 2  ;;  %v819_v50 = vrot.slane %v789_v7, 1  ;;  %v3062_v35 = vld [vmem:[#allocation3 + $0x39] sm:$0x1] }
 0x19c   :  { %v808_v9 = vsel %vm81_vm0, %v807_v60, %v782_v46  ;;  %3029 = vlog2.f32 %v1058_v13  ;;  %2832 = vmatprep.subr.bf16.mxu0 %v3210_v14 }
 0x19d   :  { %v810_v15 = vsel %vm84_vm1, %v809_v45, %v808_v9  ;;  %v3028_v39 = vpop.eup %3027 }
 0x19e   :  { %v812_v24 = vsel %vm87_vm2, %v811_v38, %v810_v15  ;;  %v468_v1 = vmul.f32 0.6931472, %v3028_v39 }
 0x19f   :  { %v814_v3 = vsel %vm90_vm3, %v813_v29, %v812_v24  ;;  %v2633_v29 = vld [vmem:[#allocation6 + $0x30] sm:$0xff]  }
 0x1a0   :  { %v816_v6 = vsel %vm93_vm4, %v815_v16, %v814_v3  ;;  %v469_v43 = vadd.f32 %v468_v1, %v3564_v58  ;;  %v3063_v3 = vld [vmem:[#allocation3 + $0xb] sm:$0x1] }
 0x1a1   :  { %v818_v52 = vsel %vm96_vm5, %v817_v4, %v816_v6  ;;  %v3064_v6 = vld [vmem:[#allocation3 + $0x13] sm:$0x1] }
 0x1a2   :  { %v820_v2 = vsel %vm99_vm6, %v819_v50, %v818_v52  ;;  %v471_v56 = vrot.slane %v469_v43, 1  ;;  %v472_v44 = vrot.slane %v469_v43, 2  ;;  %v473_v19 = vrot.slane %v469_v43, 3 }
 0x1a3   :  { %v474_v5 = vrot.slane %v469_v43, 4  ;;  %2751 = vmatmul.mubr.msk.f32.vlgmr.msra.gmra.mrb[2].mxu0 %vm102_vm7, %v820_v2  ;;  %v475_v37 = vrot.slane %v469_v43, 5  ;;  %v476_v57 = vrot.slane %v469_v43, 6  ;;  %v477_v10 = vrot.slane %v469_v43, 7 }
 0x1a4   :  { %2834 = vmatpush3.bf16.msra.mxu0 %v2641_v41  ;;  %2772 = vmatprep.mubr.msk.f32.mxu0 %vm3211_vm8, %v3212_v34  ;;  %v487_v58 = vsub.f32 %v3055_v47, %v471_v56  ;;  %v488_v27 = vsub.f32 %v3056_v12, %v472_v44  ;;  %v489_v48 = vsub.f32 %v3057_v0, %v473_v19  ;;  %v3066_v41 = vld [vmem:[#allocation3 + $0x23] sm:$0x1]  ;;  %v2675_v47 = vld [vmem:[#allocation6 + $0x38] sm:$0xff]  }
 0x1a5   :  { %2835 = vmatprep.subr.bf16.mxu0 %v3210_v14  ;;  %v490_v32 = vsub.f32 %v3058_v62, %v474_v5  ;;  %v1354_v53 = vpop.xlane.xlu0 %1353  ;;  %v486_v28 = vsub.f32 %v3059_v40, %v469_v43  ;;  %v491_v36 = vsub.f32 %v3060_v31, %v475_v37  ;;  %v492_v30 = vsub.f32 %v3061_v63, %v476_v57  ;;  %v3065_v43 = vld [vmem:[#allocation3 + $0x1b] sm:$0x1]  ;;  %v3067_v44 = vld [vmem:[#allocation3 + $0x3] sm:$0x1]  ;;  %v3068_v5 = vld [vmem:[#allocation3 + $0x2b] sm:$0x1] }
 0x1a6   :  { %v511_v33 = vrot.slane %v487_v58, 7  ;;  %v513_v18 = vrot.slane %v488_v27, 6  ;;  %v3030_v55 = vpop.eup %3029  ;;  %3031 = vlog2.f32 %v1354_v53  ;;  %v493_v21 = vsub.f32 %v3062_v35, %v477_v10  ;;  %v3069_v58 = vld [vmem:[#allocation3 + $0x33] sm:$0x1]  ;;  %v3070_v27 = vld [vmem:[#allocation3 + $0x3b] sm:$0x1] }
 0x1a7   :  { %v1060_v22 = vmul.f32 0.6931472, %v3030_v55  ;;  %v515_v49 = vrot.slane %v489_v48, 5  ;;  %v517_v61 = vrot.slane %v490_v32, 4  ;;  %v519_v45 = vrot.slane %v491_v36, 3 }
 0x1a8   :  { %2837 = vmatpush3.bf16.msra.mxu0 %v2676_v54  ;;  %v512_v42 = vsel %vm81_vm0, %v511_v33, %v486_v28  ;;  %v521_v11 = vrot.slane %v492_v30, 2  ;;  %v523_v51 = vrot.slane %v493_v21, 1 }
 0x1a9   :  { %2844 = vmatprep.subr.bf16.mxu0 %v3210_v14  ;;  %v514_v46 = vsel %vm84_vm1, %v513_v18, %v512_v42  ;;  %v1061_v25 = vadd.f32 %v1060_v22, %v3577_v59  ;;  %v2649_v42 = vld [vmem:[#allocation6 + $0x50] sm:$0xff]  }
 0x1aa   :  { %v516_v60 = vsel %vm87_vm2, %v515_v49, %v514_v46 }
 0x1ab   :  { %v518_v26 = vsel %vm90_vm3, %v517_v61, %v516_v60  ;;  %v1063_v9 = vrot.slane %v1061_v25, 1  ;;  %v1064_v38 = vrot.slane %v1061_v25, 2  ;;  %v1065_v13 = vrot.slane %v1061_v25, 3  ;;  %v3071_v60 = vld [vmem:[#allocation3 + $0xc] sm:$0x1] }
 0x1ac   :  { %v520_v7 = vsel %vm93_vm4, %v519_v45, %v518_v26  ;;  %v1066_v39 = vrot.slane %v1061_v25, 4  ;;  %v1067_v24 = vrot.slane %v1061_v25, 5  ;;  %v1068_v16 = vrot.slane %v1061_v25, 6  ;;  %v3072_v26 = vld [vmem:[#allocation3 + $0x14] sm:$0x1] }
 0x1ad   :  { %v522_v15 = vsel %vm96_vm5, %v521_v11, %v520_v7  ;;  %v1069_v1 = vrot.slane %v1061_v25, 7  ;;  %v1079_v4 = vsub.f32 %v3063_v3, %v1063_v9  ;;  %v1080_v50 = vsub.f32 %v3064_v6, %v1064_v38  ;;  %v3074_v9 = vld [vmem:[#allocation3 + $0x24] sm:$0x1] }
 0x1ae   :  { %v524_v59 = vsel %vm99_vm6, %v523_v51, %v522_v15  ;;  %v1081_v52 = vsub.f32 %v3065_v43, %v1065_v13  ;;  %v1082_v2 = vsub.f32 %v3066_v41, %v1066_v39  ;;  %v1078_v19 = vsub.f32 %v3067_v44, %v1061_v25  ;;  %v3073_v51 = vld [vmem:[#allocation3 + $0x1c] sm:$0x1]  ;;  %v3075_v13 = vld [vmem:[#allocation3 + $0x4] sm:$0x1] }
 0x1af   :  { %2740 = vmatmul.mubr.msk.f32.vlgmr.msra.gmra.mrb[0].mxu1 %vm102_vm7, %v524_v59  ;;  %v1650_v56 = vpop.xlane.xlu1 %1649  ;;  %v1083_v37 = vsub.f32 %v3068_v5, %v1067_v24  ;;  %v1103_v57 = vrot.slane %v1079_v4, 7  ;;  %v1084_v12 = vsub.f32 %v3069_v58, %v1068_v16  ;;  %v1085_v0 = vsub.f32 %v3070_v27, %v1069_v1  ;;  %v3077_v1 = vld [vmem:[#allocation3 + $0x34] sm:$0x1]  ;;  %v3078_v4 = vld [vmem:[#allocation3 + $0x3c] sm:$0x1] }
 0x1b0   :  { %2828 = vmatpush3.bf16.msra.mxu1 %v2633_v29  ;;  %2761 = vmatprep.mubr.msk.f32.mxu1 %vm3211_vm8, %v3212_v34  ;;  %v3032_v10 = vpop.eup %3031  ;;  %3033 = vlog2.f32 %v1650_v56  ;;  %v1105_v48 = vrot.slane %v1080_v50, 6  ;;  %v1107_v32 = vrot.slane %v1081_v52, 5  ;;  %v1109_v40 = vrot.slane %v1082_v2, 4  ;;  %v3076_v29 = vld [vmem:[#allocation3 + $0x2c] sm:$0x1]  ;;  %v2677_v43 = vld [vmem:[#allocation6 + $0x58] sm:$0xff]  }
 0x1b1   :  { %2829 = vmatprep.subr.bf16.mxu1 %v3210_v14  ;;  %v1356_v54 = vmul.f32 0.6931472, %v3032_v10  ;;  %v1104_v62 = vsel %vm81_vm0, %v1103_v57, %v1078_v19  ;;  %v1111_v36 = vrot.slane %v1083_v37, 3  ;;  %v1113_v18 = vrot.slane %v1084_v12, 2 }
 0x1b2   :  { %v1106_v53 = vsel %vm84_vm1, %v1105_v48, %v1104_v62  ;;  %v1115_v55 = vrot.slane %v1085_v0, 1 }
 0x1b3   :  { %v1357_v28 = vadd.f32 %v1356_v54, %v3586_v8  ;;  %v1108_v31 = vsel %vm87_vm2, %v1107_v32, %v1106_v53  ;;  %v2657_v54 = vld [vmem:[#allocation6 + $0x60] sm:$0xff]  }
 0x1b4   :  { %2831 = vmatpush3.bf16.msra.mxu1 %v2675_v47  ;;  %v1110_v33 = vsel %vm90_vm3, %v1109_v40, %v1108_v31 }
 0x1b5   :  { %2838 = vmatprep.subr.bf16.mxu1 %v3210_v14  ;;  %v1112_v63 = vsel %vm93_vm4, %v1111_v36, %v1110_v33  ;;  %v1359_v30 = vrot.slane %v1357_v28, 1  ;;  %v1360_v35 = vrot.slane %v1357_v28, 2  ;;  %v1361_v21 = vrot.slane %v1357_v28, 3  ;;  %v3080_v36 = vld [vmem:[#allocation3 + $0x15] sm:$0x1] }
 0x1b6   :  { %v1114_v22 = vsel %vm96_vm5, %v1113_v18, %v1112_v63  ;;  %v1362_v49 = vrot.slane %v1357_v28, 4  ;;  %v1363_v8 = vrot.slane %v1357_v28, 5  ;;  %v1364_v46 = vrot.slane %v1357_v28, 6  ;;  %v3081_v18 = vld [vmem:[#allocation3 + $0x1d] sm:$0x1] }
 0x1b7   :  { %v1116_v61 = vsel %vm99_vm6, %v1115_v55, %v1114_v22  ;;  %v1365_v25 = vrot.slane %v1357_v28, 7  ;;  %v1375_v45 = vsub.f32 %v3071_v60, %v1359_v30  ;;  %v1376_v11 = vsub.f32 %v3072_v26, %v1360_v35  ;;  %v3082_v63 = vld [vmem:[#allocation3 + $0x25] sm:$0x1]  ;;  %v3084_v22 = vld [vmem:[#allocation3 + $0x2d] sm:$0x1] }
 0x1b8   :  { %2762 = vmatmul.mubr.msk.f32.vlgmr.msra.gmra.mrb[2].mxu1 %vm102_vm7, %v1116_v61  ;;  %v1377_v7 = vsub.f32 %v3073_v51, %v1361_v21  ;;  %v1378_v38 = vsub.f32 %v3074_v9, %v1362_v49  ;;  %v1374_v15 = vsub.f32 %v3075_v13, %v1357_v28  ;;  %v1379_v39 = vsub.f32 %v3076_v29, %v1363_v8  ;;  %v3079_v28 = vld [vmem:[#allocation3 + $0xd] sm:$0x1]  ;;  %v3083_v35 = vld [vmem:[#allocation3 + $0x5] sm:$0x1]  ;;  %v3085_v8 = vld [vmem:[#allocation3 + $0x35] sm:$0x1] }
 0x1b9   :  { %2840 = vmatpush3.bf16.msra.mxu1 %v2649_v42  ;;  %v1399_v24 = vrot.slane %v1375_v45, 7  ;;  %2783 = vmatprep.mubr.msk.f32.mxu1 %vm3211_vm8, %v3212_v34  ;;  %v1380_v3 = vsub.f32 %v3077_v1, %v1364_v46  ;;  %v1381_v6 = vsub.f32 %v3078_v4, %v1365_v25  ;;  %v1401_v50 = vrot.slane %v1376_v11, 6  ;;  %v2678_v25 = vld [vmem:[#allocation6 + $0x68] sm:$0xff]   ;;  %v3086_v26 = vld [vmem:[#allocation3 + $0x3d] sm:$0x1]  ;;  %v2665_v4 = vld [vmem:[#allocation6 + $0x70] sm:$0xff]  }
 0x1ba   :  { %v3034_v16 = vpop.eup %3033  ;;  %v1946_v59 = vpop.xlane.xlu0 %1945  ;;  %2841 = vmatprep.subr.bf16.mxu1 %v3210_v14  ;;  %v1403_v2 = vrot.slane %v1377_v7, 5  ;;  %v1405_v44 = vrot.slane %v1378_v38, 4  ;;  %v1407_v37 = vrot.slane %v1379_v39, 3 }
 0x1bb   :  { %v1652_v52 = vmul.f32 0.6931472, %v3034_v16  ;;  %3035 = vlog2.f32 %v1946_v59  ;;  %v1400_v41 = vsel %vm81_vm0, %v1399_v24, %v1374_v15  ;;  %v1409_v10 = vrot.slane %v1380_v3, 2 }
 0x1bc   :  { %v1402_v56 = vsel %vm84_vm1, %v1401_v50, %v1400_v41  ;;  %v1411_v47 = vrot.slane %v1381_v6, 1 }
 0x1bd   :  { %v1653_v19 = vadd.f32 %v1652_v52, %v3598_v23  ;;  %v1404_v5 = vsel %vm87_vm2, %v1403_v2, %v1402_v56  ;;  %2843 = vmatpush3.bf16.msra.mxu1 %v2677_v43 }
 0x1be   :  { %v1406_v57 = vsel %vm90_vm3, %v1405_v44, %v1404_v5  ;;  %2850 = vmatprep.subr.bf16.mxu1 %v3210_v14  ;;  %v3087_v44 = vld [vmem:[#allocation3 + $0xe] sm:$0x1]  ;;  %v3088_v5 = vld [vmem:[#allocation3 + $0x16] sm:$0x1] }
 0x1bf   :  { %v1408_v58 = vsel %vm93_vm4, %v1407_v37, %v1406_v57  ;;  %v1655_v12 = vrot.slane %v1653_v19, 1  ;;  %v1656_v27 = vrot.slane %v1653_v19, 2  ;;  %v1657_v0 = vrot.slane %v1653_v19, 3  ;;  %v3089_v57 = vld [vmem:[#allocation3 + $0x1e] sm:$0x1] }
 0x1c0   :  { %v1410_v48 = vsel %vm96_vm5, %v1409_v10, %v1408_v58  ;;  %v1658_v62 = vrot.slane %v1653_v19, 4  ;;  %v1659_v23 = vrot.slane %v1653_v19, 5  ;;  %v1660_v32 = vrot.slane %v1653_v19, 6 }
 0x1c1   :  { %v1412_v53 = vsel %vm99_vm6, %v1411_v47, %v1410_v48  ;;  %v1661_v40 = vrot.slane %v1653_v19, 7  ;;  %v1671_v31 = vsub.f32 %v3079_v28, %v1655_v12  ;;  %v1672_v33 = vsub.f32 %v3080_v36, %v1656_v27  ;;  %v3090_v47 = vld [vmem:[#allocation3 + $0x26] sm:$0x1]  ;;  %v3094_v28 = vld [vmem:[#allocation3 + $0x3e] sm:$0x1] }
 0x1c2   :  { %2773 = vmatmul.mubr.msk.f32.vlgmr.msra.gmra.mrb[4].mxu0 %vm102_vm7, %v1412_v53  ;;  %v1673_v55 = vsub.f32 %v3081_v18, %v1657_v0  ;;  %v1674_v30 = vsub.f32 %v3082_v63, %v1658_v62  ;;  %v1670_v21 = vsub.f32 %v3083_v35, %v1653_v19  ;;  %v1675_v42 = vsub.f32 %v3084_v22, %v1659_v23  ;;  %v3091_v12 = vld [vmem:[#allocation3 + $0x6] sm:$0x1]  ;;  %v3092_v0 = vld [vmem:[#allocation3 + $0x2e] sm:$0x1]  ;;  %v2679_v23 = vld [vmem:[#allocation6 + $0x78] sm:$0xff]  }
 0x1c3   :  { %2846 = vmatpush3.bf16.msra.mxu0 %v2657_v54  ;;  %v1695_v49 = vrot.slane %v1671_v31, 7  ;;  %2794 = vmatprep.mubr.msk.f32.mxu0 %vm3211_vm8, %v3212_v34  ;;  %v1676_v46 = vsub.f32 %v3085_v8, %v1660_v32  ;;  %v1697_v61 = vrot.slane %v1672_v33, 6  ;;  %v1677_v11 = vsub.f32 %v3086_v26, %v1661_v40  ;;  %v3093_v32 = vld [vmem:[#allocation3 + $0x36] sm:$0x1] }
 0x1c4   :  { %2847 = vmatprep.subr.bf16.mxu0 %v3210_v14  ;;  %v2242_v45 = vpop.xlane.xlu1 %2241  ;;  %v1699_v7 = vrot.slane %v1673_v55, 5  ;;  %v1701_v13 = vrot.slane %v1674_v30, 4  ;;  %v1703_v29 = vrot.slane %v1675_v42, 3 }
 0x1c5   :  { %v3036_v60 = vpop.eup %3035  ;;  %v1696_v51 = vsel %vm81_vm0, %v1695_v49, %v1670_v21  ;;  %3037 = vlog2.f32 %v2242_v45  ;;  %v1705_v16 = vrot.slane %v1676_v46, 2  ;;  %v1707_v1 = vrot.slane %v1677_v11, 1 }
 0x1c6   :  { %v1948_v9 = vmul.f32 0.6931472, %v3036_v60  ;;  %v1698_v38 = vsel %vm84_vm1, %v1697_v61, %v1696_v51 }
 0x1c7   :  { %v1700_v15 = vsel %vm87_vm2, %v1699_v7, %v1698_v38  ;;  %2849 = vmatpush3.bf16.msra.mxu0 %v2678_v25  ;;  %v3096_v7 = vld [vmem:[#allocation3 + $0x17] sm:$0x1]  ;;  %v3097_v38 = vld [vmem:[#allocation3 + $0x1f] sm:$0x1] }
 0x1c8   :  { %v1949_v39 = vadd.f32 %v1948_v9, %v3612_v17  ;;  %v1702_v24 = vsel %vm90_vm3, %v1701_v13, %v1700_v15  ;;  %v3098_v15 = vld [vmem:[#allocation3 + $0x27] sm:$0x1] }
 0x1c9   :  { %v1704_v59 = vsel %vm93_vm4, %v1703_v29, %v1702_v24 }
 0x1ca   :  { %v1706_v3 = vsel %vm96_vm5, %v1705_v16, %v1704_v59  ;;  %v1951_v6 = vrot.slane %v1949_v39, 1  ;;  %v1952_v50 = vrot.slane %v1949_v39, 2  ;;  %v1953_v43 = vrot.slane %v1949_v39, 3  ;;  %v3100_v16 = vld [vmem:[#allocation3 + $0x2f] sm:$0x1] }
 0x1cb   :  { %v1708_v52 = vsel %vm99_vm6, %v1707_v1, %v1706_v3  ;;  %v1954_v41 = vrot.slane %v1949_v39, 4  ;;  %v1955_v2 = vrot.slane %v1949_v39, 5  ;;  %v1956_v56 = vrot.slane %v1949_v39, 6 }
 0x1cc   :  { %2784 = vmatmul.mubr.msk.f32.vlgmr.msra.gmra.mrb[4].mxu1 %vm102_vm7, %v1708_v52  ;;  %v1957_v17 = vrot.slane %v1949_v39, 7  ;;  %v1967_v19 = vsub.f32 %v3087_v44, %v1951_v6  ;;  %v1968_v37 = vsub.f32 %v3088_v5, %v1952_v50  ;;  %v1969_v10 = vsub.f32 %v3089_v57, %v1953_v43  ;;  %v3102_v50 = vld [vmem:[#allocation3 + $0x3f] sm:$0x1] }
 0x1cd   :  { %2852 = vmatpush3.bf16.msra.mxu1 %v2665_v4  ;;  %v1970_v58 = vsub.f32 %v3090_v47, %v1954_v41  ;;  %v1966_v27 = vsub.f32 %v3091_v12, %v1949_v39  ;;  %v1971_v48 = vsub.f32 %v3092_v0, %v1955_v2  ;;  %2805 = vmatprep.mubr.msk.f32.mxu1 %vm3211_vm8, %v3212_v34  ;;  %v3099_v39 = vld [vmem:[#allocation3 + $0x7] sm:$0x1]  ;;  %v3101_v4 = vld [vmem:[#allocation3 + $0x37] sm:$0x1]  ;;  %v3213_v0 = vmov 1966171168  }
 0x1ce   :  { %v1991_v54 = vrot.slane %v1967_v19, 7  ;;  %v1993_v62 = vrot.slane %v1968_v37, 6  ;;  %2853 = vmatprep.subr.bf16.mxu1 %v3210_v14  ;;  %v1972_v53 = vsub.f32 %v3093_v32, %v1956_v56  ;;  %v1973_v31 = vsub.f32 %v3094_v28, %v1957_v17  ;;  %v3884_v12 = vld [vmem:[%s3975_s3] sm:$0xff]  ;;  %s3953_s3 = smov (!%p2605_p1), 1  }
 0x1cf   :  { %v3038_v40 = vpop.eup %3037  ;;  %v1995_v33 = vrot.slane %v1969_v10, 5  ;;  %v1997_v63 = vrot.slane %v1970_v58, 4  ;;  %v1999_v14 = vrot.slane %v1971_v48, 3  ;;  %v3879_v58 = vld [vmem:[%s3974_s2] sm:$0xff]  ;;  %s3895_s2 = scalar_select %p2478_p0, %s4052_s1, 8  ;;  %v304_v48 = vunpack.c.l.s4 %v3213_v0 }
 0x1d0   :  { %v1992_v36 = vsel %vm81_vm0, %v1991_v54, %v1966_v27  ;;  %v2244_v18 = vmul.f32 0.6931472, %v3038_v40  ;;  %v2001_v21 = vrot.slane %v1972_v53, 2  ;;  %v2003_v42 = vrot.slane %v1973_v31, 1  ;;  %v3889_v27 = vld [vmem:[%s3976_s4] sm:$0xff] }
 0x1d1   :  { %v1994_v55 = vsel %vm84_vm1, %v1993_v62, %v1992_v36  ;;  %2855 = vmatpush3.bf16.msra.mxu1 %v2679_v23  ;;  %v306_v54 = vlaneseq  ;;  %v305_v62 = vunpack.c.0.s8 %v304_v48 }
 0x1d2   :  { %v1996_v30 = vsel %vm87_vm2, %v1995_v33, %v1994_v55  ;;  %v2245_v35 = vadd.f32 %v2244_v18, %v3623_v20  ;;  %v3095_v20 = vld [vmem:[#allocation3 + $0xf] sm:$0x1] }
 0x1d3   :  { %v1998_v34 = vsel %vm90_vm3, %v1997_v63, %v1996_v30  ;;  %v307_v23 = vshrl.u32 %v306_v54, 7 }
 0x1d4   :  { %v2000_v22 = vsel %vm93_vm4, %v1999_v14, %v1998_v34  ;;  %v2247_v8 = vrot.slane %v2245_v35, 1  ;;  %v2248_v46 = vrot.slane %v2245_v35, 2  ;;  %v2249_v61 = vrot.slane %v2245_v35, 3 }
 0x1d5   :  { %v2002_v49 = vsel %vm96_vm5, %v2001_v21, %v2000_v22  ;;  %v2250_v60 = vrot.slane %v2245_v35, 4  ;;  %v2251_v45 = vrot.slane %v2245_v35, 5  ;;  %v2252_v26 = vrot.slane %v2245_v35, 6 }
 0x1d6   :  { %v2004_v25 = vsel %vm99_vm6, %v2003_v42, %v2002_v49  ;;  %v2253_v11 = vrot.slane %v2245_v35, 7  ;;  %v2263_v51 = vsub.f32 %v3095_v20, %v2247_v8  ;;  %v2264_v9 = vsub.f32 %v3096_v7, %v2248_v46 }
 0x1d7   :  { %2795 = vmatmul.mubr.msk.f32.vlgmr.msra.gmra.mrb[6].mxu0 %vm102_vm7, %v2004_v25  ;;  %v2265_v13 = vsub.f32 %v3097_v38, %v2249_v61  ;;  %v2266_v29 = vsub.f32 %v3098_v15, %v2250_v60  ;;  %v2262_v24 = vsub.f32 %v3099_v39, %v2245_v35  ;;  %v2267_v59 = vsub.f32 %v3100_v16, %v2251_v45 }
 0x1d8   :  { %v2287_v1 = vrot.slane %v2263_v51, 7  ;;  %v2289_v3 = vrot.slane %v2264_v9, 6  ;;  %v2268_v6 = vsub.f32 %v3101_v4, %v2252_v26  ;;  %v2269_v43 = vsub.f32 %v3102_v50, %v2253_v11 }
 0x1d9   :  { %v2291_v41 = vrot.slane %v2265_v13, 5  ;;  %v2293_v56 = vrot.slane %v2266_v29, 4  ;;  %v2295_v44 = vrot.slane %v2267_v59, 3  ;;  %v3898_v32 = vsub.s32 %v305_v62, %v307_v23 }
 0x1da   :  { %v2288_v52 = vsel %vm81_vm0, %v2287_v1, %v2262_v24  ;;  %v2297_v5 = vrot.slane %v2268_v6, 2  ;;  %v2299_v57 = vrot.slane %v2269_v43, 1 }
 0x1db   :  { %v2290_v2 = vsel %vm84_vm1, %v2289_v3, %v2288_v52 }
 0x1dc   :  { %v2292_v17 = vsel %vm87_vm2, %v2291_v41, %v2290_v2 }
 0x1dd   :  { %v2294_v19 = vsel %vm90_vm3, %v2293_v56, %v2292_v17 }
 0x1de   :  { %v2296_v37 = vsel %vm93_vm4, %v2295_v44, %v2294_v19 }
 0x1df   :  { %v2298_v10 = vsel %vm96_vm5, %v2297_v5, %v2296_v37 }
 0x1e0   :  { %v2300_v47 = vsel %vm99_vm6, %v2299_v57, %v2298_v10 }
 0x1e1   :  { %2806 = vmatmul.mubr.msk.f32.vlgmr.msra.gmra.mrb[6].mxu1 %vm102_vm7, %v2300_v47 }
 0x269   :  { %v297_v53 = vpop.f32.mrb[0].mxu0 }
 0x26a   :  { %v302_v40 = vcombine.high %v297_v53, %v297_v53  ;;  %v309_v28 = vrot.slane %v297_v53, %v3898_v32  ;;  %v2730_v31 = vpop.f32.mrb[1].mxu0 }
 0x26c   :  { %v316_v36 = vrot.slane %v302_v40, %v3898_v32  ;;  %v317_v33 = vcombine.high %v309_v28, %v309_v28  ;;  %v325_v18 = vrot.slane %v309_v28, %v3898_v32  ;;  %2557 = vst.sshfl [vmem:[#allocation2] sm:$0x1 pattern:$0x73625140] %v309_v28 }
 0x26e   :  { %v318_v55 = vcombine.high %v316_v36, %v316_v36  ;;  %v332_v63 = vrot.slane %v316_v36, %v3898_v32  ;;  %v339_v30 = vrot.slane %v317_v33, %v3898_v32  ;;  %v347_v14 = vcombine.high %v325_v18, %v325_v18  ;;  %2558 = vst.sshfl [vmem:[#allocation2 + $0x8] sm:$0x1 pattern:$0x73625140] %v317_v33 }
 0x26f   :  { %2559 = vst.sshfl [vmem:[#allocation2 + $0x20] sm:$0x1 pattern:$0x73625140] %v316_v36 }
 0x270   :  { %v346_v35 = vrot.slane %v318_v55, %v3898_v32  ;;  %v348_v34 = vcombine.high %v332_v63, %v332_v63  ;;  %v349_v21 = vcombine.high %v339_v30, %v339_v30  ;;  %361 = vst [vmem:[#allocation2 + $0x10] sm:$0x1] %v347_v14  ;;  %2560 = vst.sshfl [vmem:[#allocation2 + $0x28] sm:$0x1 pattern:$0x73625140] %v318_v55 }
 0x272   :  { %v350_v22 = vcombine.high %v346_v35, %v346_v35  ;;  %362 = vst [vmem:[#allocation2 + $0x18] sm:$0x1] %v349_v21  ;;  %365 = vst [vmem:[#allocation2 + $0x30] sm:$0x1] %v348_v34 }
 0x274   :  { %366 = vst [vmem:[#allocation2 + $0x38] sm:$0x1] %v350_v22 }
 0x276   :  { %v889_v42 = vpop.f32.mrb[2].mxu0 }
 0x277   :  { %v894_v49 = vcombine.high %v889_v42, %v889_v42  ;;  %v901_v8 = vrot.slane %v889_v42, %v3898_v32  ;;  %v2752_v46 = vpop.f32.mrb[3].mxu0 }
 0x279   :  { %v908_v61 = vrot.slane %v894_v49, %v3898_v32  ;;  %v909_v25 = vcombine.high %v901_v8, %v901_v8  ;;  %v917_v60 = vrot.slane %v901_v8, %v3898_v32  ;;  %2567 = vst.sshfl [vmem:[#allocation2 + $0x2] sm:$0x1 pattern:$0x73625140] %v901_v8 }
 0x27b   :  { %v910_v45 = vcombine.high %v908_v61, %v908_v61  ;;  %v924_v26 = vrot.slane %v908_v61, %v3898_v32  ;;  %v931_v11 = vrot.slane %v909_v25, %v3898_v32  ;;  %v939_v20 = vcombine.high %v917_v60, %v917_v60  ;;  %2568 = vst.sshfl [vmem:[#allocation2 + $0xa] sm:$0x1 pattern:$0x73625140] %v909_v25 }
 0x27c   :  { %2569 = vst.sshfl [vmem:[#allocation2 + $0x22] sm:$0x1 pattern:$0x73625140] %v908_v61 }
 0x27d   :  { %v938_v51 = vrot.slane %v910_v45, %v3898_v32  ;;  %v940_v7 = vcombine.high %v924_v26, %v924_v26  ;;  %v941_v9 = vcombine.high %v931_v11, %v931_v11  ;;  %953 = vst [vmem:[#allocation2 + $0x12] sm:$0x1] %v939_v20  ;;  %2570 = vst.sshfl [vmem:[#allocation2 + $0x2a] sm:$0x1 pattern:$0x73625140] %v910_v45 }
 0x27f   :  { %v942_v38 = vcombine.high %v938_v51, %v938_v51  ;;  %954 = vst [vmem:[#allocation2 + $0x1a] sm:$0x1] %v941_v9  ;;  %957 = vst [vmem:[#allocation2 + $0x32] sm:$0x1] %v940_v7 }
 0x281   :  { %958 = vst [vmem:[#allocation2 + $0x3a] sm:$0x1] %v942_v38 }
 0x282   :  { %v593_v13 = vpop.f32.mrb[0].mxu1 }
 0x283   :  { %v598_v15 = vcombine.high %v593_v13, %v593_v13  ;;  %v605_v29 = vrot.slane %v593_v13, %v3898_v32  ;;  %v2741_v39 = vpop.f32.mrb[1].mxu1 }
 0x285   :  { %v612_v24 = vrot.slane %v598_v15, %v3898_v32  ;;  %v613_v16 = vcombine.high %v605_v29, %v605_v29  ;;  %v621_v59 = vrot.slane %v605_v29, %v3898_v32  ;;  %2562 = vst.sshfl [vmem:[#allocation2 + $0x1] sm:$0x1 pattern:$0x73625140] %v605_v29 }
 0x287   :  { %v614_v1 = vcombine.high %v612_v24, %v612_v24  ;;  %v628_v3 = vrot.slane %v612_v24, %v3898_v32  ;;  %v635_v4 = vrot.slane %v613_v16, %v3898_v32  ;;  %v643_v6 = vcombine.high %v621_v59, %v621_v59  ;;  %2563 = vst.sshfl [vmem:[#allocation2 + $0x9] sm:$0x1 pattern:$0x73625140] %v613_v16 }
 0x288   :  { %2564 = vst.sshfl [vmem:[#allocation2 + $0x21] sm:$0x1 pattern:$0x73625140] %v612_v24 }
 0x289   :  { %v642_v50 = vrot.slane %v614_v1, %v3898_v32  ;;  %v644_v43 = vcombine.high %v628_v3, %v628_v3  ;;  %v645_v52 = vcombine.high %v635_v4, %v635_v4  ;;  %657 = vst [vmem:[#allocation2 + $0x11] sm:$0x1] %v643_v6  ;;  %2565 = vst.sshfl [vmem:[#allocation2 + $0x29] sm:$0x1 pattern:$0x73625140] %v614_v1 }
 0x28b   :  { %v646_v41 = vcombine.high %v642_v50, %v642_v50  ;;  %658 = vst [vmem:[#allocation2 + $0x19] sm:$0x1] %v645_v52  ;;  %661 = vst [vmem:[#allocation2 + $0x31] sm:$0x1] %v644_v43  ;;  %v1185_v2 = vpop.f32.mrb[2].mxu1 }
 0x28c   :  { %v1190_v56 = vcombine.high %v1185_v2, %v1185_v2  ;;  %v1197_v17 = vrot.slane %v1185_v2, %v3898_v32  ;;  %v2763_v44 = vpop.f32.mrb[3].mxu1 }
 0x28d   :  { %662 = vst [vmem:[#allocation2 + $0x39] sm:$0x1] %v646_v41 }
 0x28e   :  { %v1204_v19 = vrot.slane %v1190_v56, %v3898_v32  ;;  %v1205_v5 = vcombine.high %v1197_v17, %v1197_v17  ;;  %v1213_v37 = vrot.slane %v1197_v17, %v3898_v32  ;;  %2572 = vst.sshfl [vmem:[#allocation2 + $0x3] sm:$0x1 pattern:$0x73625140] %v1197_v17  ;;  %v3943_v17 = vand.u32 127, %v306_v54 }
 0x290   :  { %v1206_v57 = vcombine.high %v1204_v19, %v1204_v19  ;;  %v1220_v10 = vrot.slane %v1204_v19, %v3898_v32  ;;  %v1227_v47 = vrot.slane %v1205_v5, %v3898_v32  ;;  %v1235_v0 = vcombine.high %v1213_v37, %v1213_v37  ;;  %2573 = vst.sshfl [vmem:[#allocation2 + $0xb] sm:$0x1 pattern:$0x73625140] %v1205_v5 }
 0x291   :  { %2574 = vst.sshfl [vmem:[#allocation2 + $0x23] sm:$0x1 pattern:$0x73625140] %v1204_v19  ;;  %vm2445_vm9 = vcmp.lt.s32.totalorder %v3943_v17, 2 }
 0x292   :  { %v1234_v48 = vrot.slane %v1206_v57, %v3898_v32  ;;  %v1236_v62 = vcombine.high %v1220_v10, %v1220_v10  ;;  %v1237_v23 = vcombine.high %v1227_v47, %v1227_v47  ;;  %1249 = vst [vmem:[#allocation2 + $0x13] sm:$0x1] %v1235_v0  ;;  %2575 = vst.sshfl [vmem:[#allocation2 + $0x2b] sm:$0x1 pattern:$0x73625140] %v1206_v57 }
 0x294   :  { %v1238_v53 = vcombine.high %v1234_v48, %v1234_v48  ;;  %1250 = vst [vmem:[#allocation2 + $0x1b] sm:$0x1] %v1237_v23  ;;  %1253 = vst [vmem:[#allocation2 + $0x33] sm:$0x1] %v1236_v62 }
 0x295   :  { %v1481_v40 = vpop.f32.mrb[4].mxu0 }
 0x296   :  { %1254 = vst [vmem:[#allocation2 + $0x3b] sm:$0x1] %v1238_v53  ;;  %v1486_v28 = vcombine.high %v1481_v40, %v1481_v40  ;;  %v1493_v31 = vrot.slane %v1481_v40, %v3898_v32  ;;  %v2774_v36 = vpop.f32.mrb[5].mxu0  ;;  %v3214_v40 = vmov -1e+30  }
 0x298   :  { %v1500_v33 = vrot.slane %v1486_v28, %v3898_v32  ;;  %v1501_v18 = vcombine.high %v1493_v31, %v1493_v31  ;;  %v1509_v55 = vrot.slane %v1493_v31, %v3898_v32  ;;  %2577 = vst.sshfl [vmem:[#allocation2 + $0x4] sm:$0x1 pattern:$0x73625140] %v1493_v31  ;;  %v2446_v28 = vsel %vm2445_vm9, 0.0, %v3214_v40 }
 0x29a   :  { %v1502_v63 = vcombine.high %v1500_v33, %v1500_v33  ;;  %v1516_v30 = vrot.slane %v1500_v33, %v3898_v32  ;;  %v1523_v14 = vrot.slane %v1501_v18, %v3898_v32  ;;  %v1531_v35 = vcombine.high %v1509_v55, %v1509_v55  ;;  %2578 = vst.sshfl [vmem:[#allocation2 + $0xc] sm:$0x1 pattern:$0x73625140] %v1501_v18 }
 0x29b   :  { %2579 = vst.sshfl [vmem:[#allocation2 + $0x24] sm:$0x1 pattern:$0x73625140] %v1500_v33 }
 0x29c   :  { %v1530_v34 = vrot.slane %v1502_v63, %v3898_v32  ;;  %v1532_v21 = vcombine.high %v1516_v30, %v1516_v30  ;;  %v1533_v22 = vcombine.high %v1523_v14, %v1523_v14  ;;  %1545 = vst [vmem:[#allocation2 + $0x14] sm:$0x1] %v1531_v35  ;;  %2580 = vst.sshfl [vmem:[#allocation2 + $0x2c] sm:$0x1 pattern:$0x73625140] %v1502_v63 }
 0x29e   :  { %v1534_v42 = vcombine.high %v1530_v34, %v1530_v34  ;;  %1546 = vst [vmem:[#allocation2 + $0x1c] sm:$0x1] %v1533_v22  ;;  %1549 = vst [vmem:[#allocation2 + $0x34] sm:$0x1] %v1532_v21 }
 0x29f   :  { %v1777_v49 = vpop.f32.mrb[4].mxu1 }
 0x2a0   :  { %1550 = vst [vmem:[#allocation2 + $0x3c] sm:$0x1] %v1534_v42  ;;  %v1782_v8 = vcombine.high %v1777_v49, %v1777_v49  ;;  %v1789_v46 = vrot.slane %v1777_v49, %v3898_v32  ;;  %v2785_v61 = vpop.f32.mrb[5].mxu1 }
 0x2a2   :  { %v1796_v25 = vrot.slane %v1782_v8, %v3898_v32  ;;  %v1797_v60 = vcombine.high %v1789_v46, %v1789_v46  ;;  %v1805_v45 = vrot.slane %v1789_v46, %v3898_v32  ;;  %2582 = vst.sshfl [vmem:[#allocation2 + $0x5] sm:$0x1 pattern:$0x73625140] %v1789_v46 }
 0x2a4   :  { %v1798_v26 = vcombine.high %v1796_v25, %v1796_v25  ;;  %v1812_v11 = vrot.slane %v1796_v25, %v3898_v32  ;;  %v1819_v20 = vrot.slane %v1797_v60, %v3898_v32  ;;  %v1827_v51 = vcombine.high %v1805_v45, %v1805_v45  ;;  %2583 = vst.sshfl [vmem:[#allocation2 + $0xd] sm:$0x1 pattern:$0x73625140] %v1797_v60 }
 0x2a5   :  { %2584 = vst.sshfl [vmem:[#allocation2 + $0x25] sm:$0x1 pattern:$0x73625140] %v1796_v25 }
 0x2a6   :  { %v1826_v7 = vrot.slane %v1798_v26, %v3898_v32  ;;  %v1828_v9 = vcombine.high %v1812_v11, %v1812_v11  ;;  %v1829_v38 = vcombine.high %v1819_v20, %v1819_v20  ;;  %1841 = vst [vmem:[#allocation2 + $0x15] sm:$0x1] %v1827_v51  ;;  %2585 = vst.sshfl [vmem:[#allocation2 + $0x2d] sm:$0x1 pattern:$0x73625140] %v1798_v26 }
 0x2a8   :  { %v1830_v13 = vcombine.high %v1826_v7, %v1826_v7  ;;  %1842 = vst [vmem:[#allocation2 + $0x1d] sm:$0x1] %v1829_v38  ;;  %1845 = vst [vmem:[#allocation2 + $0x35] sm:$0x1] %v1828_v9 }
 0x2aa   :  { %1846 = vst [vmem:[#allocation2 + $0x3d] sm:$0x1] %v1830_v13  ;;  %v2073_v15 = vpop.f32.mrb[6].mxu0 }
 0x2ab   :  { %v2078_v29 = vcombine.high %v2073_v15, %v2073_v15  ;;  %v2085_v39 = vrot.slane %v2073_v15, %v3898_v32  ;;  %v2796_v24 = vpop.f32.mrb[7].mxu0 }
 0x2ad   :  { %v2092_v16 = vrot.slane %v2078_v29, %v3898_v32  ;;  %v2093_v59 = vcombine.high %v2085_v39, %v2085_v39  ;;  %v2101_v1 = vrot.slane %v2085_v39, %v3898_v32  ;;  %2587 = vst.sshfl [vmem:[#allocation2 + $0x6] sm:$0x1 pattern:$0x73625140] %v2085_v39 }
 0x2af   :  { %v2094_v3 = vcombine.high %v2092_v16, %v2092_v16  ;;  %v2108_v4 = vrot.slane %v2092_v16, %v3898_v32  ;;  %v2115_v6 = vrot.slane %v2093_v59, %v3898_v32  ;;  %v2123_v50 = vcombine.high %v2101_v1, %v2101_v1  ;;  %2588 = vst.sshfl [vmem:[#allocation2 + $0xe] sm:$0x1 pattern:$0x73625140] %v2093_v59 }
 0x2b0   :  { %2589 = vst.sshfl [vmem:[#allocation2 + $0x26] sm:$0x1 pattern:$0x73625140] %v2092_v16 }
 0x2b1   :  { %v2122_v43 = vrot.slane %v2094_v3, %v3898_v32  ;;  %v2124_v52 = vcombine.high %v2108_v4, %v2108_v4  ;;  %v2125_v41 = vcombine.high %v2115_v6, %v2115_v6  ;;  %2137 = vst [vmem:[#allocation2 + $0x16] sm:$0x1] %v2123_v50  ;;  %2590 = vst.sshfl [vmem:[#allocation2 + $0x2e] sm:$0x1 pattern:$0x73625140] %v2094_v3 }
 0x2b3   :  { %v2126_v2 = vcombine.high %v2122_v43, %v2122_v43  ;;  %2138 = vst [vmem:[#allocation2 + $0x1e] sm:$0x1] %v2125_v41  ;;  %2141 = vst [vmem:[#allocation2 + $0x36] sm:$0x1] %v2124_v52 }
 0x2b4   :  { %v2369_v56 = vpop.f32.mrb[6].mxu1 }
 0x2b5   :  { %2142 = vst [vmem:[#allocation2 + $0x3e] sm:$0x1] %v2126_v2  ;;  %v2374_v44 = vcombine.high %v2369_v56, %v2369_v56  ;;  %v2381_v19 = vrot.slane %v2369_v56, %v3898_v32  ;;  %v2807_v5 = vpop.f32.mrb[7].mxu1 }
 0x2b7   :  { %v2388_v37 = vrot.slane %v2374_v44, %v3898_v32  ;;  %v2389_v57 = vcombine.high %v2381_v19, %v2381_v19  ;;  %v2397_v10 = vrot.slane %v2381_v19, %v3898_v32  ;;  %2592 = vst.sshfl [vmem:[#allocation2 + $0x7] sm:$0x1 pattern:$0x73625140] %v2381_v19 }
 0x2b9   :  { %v2390_v47 = vcombine.high %v2388_v37, %v2388_v37  ;;  %v2404_v0 = vrot.slane %v2388_v37, %v3898_v32  ;;  %v2411_v48 = vrot.slane %v2389_v57, %v3898_v32  ;;  %v2419_v62 = vcombine.high %v2397_v10, %v2397_v10  ;;  %2593 = vst.sshfl [vmem:[#allocation2 + $0xf] sm:$0x1 pattern:$0x73625140] %v2389_v57 }
 0x2ba   :  { %2594 = vst.sshfl [vmem:[#allocation2 + $0x27] sm:$0x1 pattern:$0x73625140] %v2388_v37 }
 0x2bb   :  { %v2418_v54 = vrot.slane %v2390_v47, %v3898_v32  ;;  %v2420_v23 = vcombine.high %v2404_v0, %v2404_v0  ;;  %v2421_v53 = vcombine.high %v2411_v48, %v2411_v48  ;;  %2433 = vst [vmem:[#allocation2 + $0x17] sm:$0x1] %v2419_v62  ;;  %2595 = vst.sshfl [vmem:[#allocation2 + $0x2f] sm:$0x1 pattern:$0x73625140] %v2390_v47 }
 0x2bc   :  { %2551 = sbr.rel (%p2605_p1) target bundleno = 874 (0x36a), region = 65 }
 0x2bd   :  { %v2422_v31 = vcombine.high %v2418_v54, %v2418_v54  ;;  %2434 = vst [vmem:[#allocation2 + $0x1f] sm:$0x1] %v2421_v53  ;;  %2437 = vst [vmem:[#allocation2 + $0x37] sm:$0x1] %v2420_v23 }
 0x2be   :  { %v2444_v36 = vld [vmem:[#allocation2] sm:$0xff] }
 0x2bf   :  { %2438 = vst [vmem:[#allocation2 + $0x3f] sm:$0x1] %v2422_v31  ;;  %v2447_v33 = vadd.f32 %v2446_v28, %v2444_v36  }
 0x2c1   :  { %v3199_v18 = vmov %v2447_v33   ;;  %v3191_v55 = vmov (!%p2605_p1), %v2447_v33  }
 0x2c3 LB: > { %v3215_v32 = vmov 0   ;;  %s3216_s4 = smov 1   ;;  %v2517_v63 = vstv %s3197_s3  ;;  %s3217_s17 = smov 2   ;;  %vm2489_vm11 = vcmp.ge.s32.totalorder %v3943_v17, 1  ;;  %vm2493_vm12 = vcmp.ge.s32.totalorder %v3943_v17, 2  ;;  %s3197_s3 = sphi %s3953_s3, %s2483_s3   ;;  %v3193_v55 = vphi %v3191_v55, %v3192_v55  }
 0x2c4   : > { %3103 = vset.pattern.permute.xlu1 %v3215_v32  ;;  %3104 = vset.pattern.permute.xlu0 %v3215_v32  ;;  %vm2518_vm10 = vcmp.lt.s32.totalorder %v2517_v63, %v3889_v27  ;;  %s2604_s18 = sshll.u32 %s3197_s3, 3  ;;  %s2483_s3 = sadd.s32 1, %s3197_s3  }
 0x2c5   : > { %2487 = vrot.lane.b32.xlu0 %v3193_v55, %s3216_s4  ;;  %v2519_v30 = vsel %vm2518_vm10, 1, %v3215_v32  ;;  %s2513_s19 = scalar_lea.vmem [#allocation2], %s2604_s18  ;;  %p2482_p2 = scmp.ge.s32.totalorder %s2483_s3, %s3895_s2 }
 0x2c6   : > { %2521 = vperm.xlu1 %3103, %v2519_v30   ;;  %v2514_v13 = vld [vmem:[%s2513_s19] sm:$0xff] }
 0x2c9   : > { %2491 = vrot.lane.b32.xlu0 %v3193_v55, %s3217_s17 }
 0x337   : > { %v2488_v14 = vpop.permute.xlu0 %2487 }
 0x338   : > { %v2490_v35 = vsel %vm2489_vm11, %v2488_v14, -1e+30 }
 0x339   : > { %v2496_v22 = vmax.f32 %v3193_v55, %v2490_v35 }
 0x33b   : > { %v2492_v34 = vpop.permute.xlu0 %2491 }
 0x33c   : > { %v2494_v21 = vsel %vm2493_vm12, %v2492_v34, -1e+30 }
 0x33d   : > { %v2495_v42 = vadd.f32 %v2494_v21, %v3879_v58 }
 0x33f   : > { %v2497_v49 = vmax.f32 %v2496_v22, %v2495_v42 }
 0x341   : > { %v2498_v8 = vsub.f32 %v3193_v55, %v2497_v49  ;;  %v2501_v46 = vsub.f32 %v2490_v35, %v2497_v49  ;;  %v2505_v61 = vsub.f32 %v2495_v42, %v2497_v49 }
 0x343   : > { %v2499_v25 = vmul.f32 1.442695, %v2498_v8  ;;  %v2502_v60 = vmul.f32 1.442695, %v2501_v46  ;;  %v2506_v45 = vmul.f32 1.442695, %v2505_v61 }
 0x345   : > { %3105 = vpow2.f32 %v2499_v25  ;;  %v2522_v15 = vpop.permute.xlu1 %2521 }
 0x346   : > { %3107 = vpow2.f32 %v2502_v60  ;;  %vm2523_vm13 = vcmp.eq.s32.totalorder %v2522_v15, 1 }
 0x347   : > { %3109 = vpow2.f32 %v2506_v45 }
 0x34f   : > { %v3106_v26 = vpop.eup %3105 }
 0x350   : > { %v3108_v11 = vpop.eup %3107 }
 0x351   : > { %v2504_v20 = vadd.f32 %v3108_v11, %v3106_v26  ;;  %v3110_v51 = vpop.eup %3109 }
 0x353   : > { %v2508_v7 = vadd.f32 %v3110_v51, %v2504_v20 }
 0x355   : > { %3111 = vlog2.f32 %v2508_v7 }
 0x35f   : > { %v3112_v9 = vpop.eup %3111 }
 0x360   : > { %v2510_v38 = vmul.f32 0.6931472, %v3112_v9 }
 0x362   : > { %v2511_v29 = vadd.f32 %v2510_v38, %v2497_v49 }
 0x363   :  { %2485 = sbr.rel (!%p2482_p2) target bundleno = 707 (0x2c3), region = 71 }
 0x364   : > { %v2515_v39 = vadd.f32 %v2514_v13, %v2511_v29 }
 0x366   : > { %v2516_v24 = vmax.f32 %v2515_v39, -1e+30 }
 0x368   : > { %v2524_v16 = vsel %vm2523_vm13, %v2516_v24, %v3193_v55  }
 0x369   : > { %v3192_v55 = vmov %v2524_v16   ;;  %v3200_v18 = vmov (%p2482_p2), %v2524_v16  }
 0x36a PF:  { %v2525_v59 = vadd.f32 %v3201_v18, %v3884_v12  ;;  %vm2537_vm14 = vcmask 7168   ;;  %v3201_v18 = vphi %v3199_v18, %v3200_v18  }
 0x36c   :  { %2526 = vmax.xlane.f32.xlu0 %v2525_v59 }
 0x3f9   :  { %v2527_v1 = vpop.xlane.xlu0 %2526 }
 0x3fa   :  { %v2528_v3 = vsub.f32 %v2525_v59, %v2527_v1 }
 0x3fc   :  { %v2529_v4 = vmul.f32 1.442695, %v2528_v3 }
 0x3fe   :  { %3113 = vpow2.f32 %v2529_v4 }
 0x408   :  { %v3114_v6 = vpop.eup %3113 }
 0x409   :  { %2531 = vadd.xlane.f32.xlu0 %v3114_v6 }
 0x496   :  { %v2532_v50 = vpop.xlane.xlu0 %2531 }
 0x497   :  { %3115 = vlog2.f32 %v2532_v50 }
 0x4a1   :  { %v3116_v43 = vpop.eup %3115 }
 0x4a2   :  { %v2534_v52 = vmul.f32 0.6931472, %v3116_v43 }
 0x4a4   :  { %v2535_v41 = vadd.f32 %v2534_v52, %v2527_v1 }
 0x4a6   :  { %v2536_v2 = vsub.f32 0.0, %v2535_v41 }
 0x4a8   :  { %2538 = vst.msk [vmem:[%s3978_s6] sm:$0xff] %vm2537_vm14, %v2536_v2 }
 0x4a9   :  { %2543 = vsyncpa [#allocation4], 1 }
 0x4aa   :  { %2544 = vsyncpa [#allocation7], 1 }
 0x4ab   :  { %2545 = vsyncpa [#allocation5], 1 }

</bundles_post_ra>
